<compile_context>
chip_gen: v7x
topology: tpu7x:2x2x1
jax: 0.10.0
libtpu: 0.0.40
codegen_flags: <defaults>
</compile_context>

<pallas_src>
import functools

import jax
import jax.numpy as jnp
from jax.experimental import pallas as pl
from jax.experimental.pallas import tpu as pltpu


# Tile preferences (shrunk automatically to the actual dims for the toy config).
TM, TN, TK = 256, 256, 2048         # dense matmul tiles (TK covers K=1024 fully)
TQ, TKV = 256, 256                  # attention q / kv tiles
TM_LN = 512                         # layernorm row tile (mem-bound, bigger=better)


def _default_vmem_limit():
    """Generation-aware VMEM budget: ~3/4 of physical, capped at 112 MiB."""
    cap = 64 * 1024 * 1024
    try:
        info = pltpu.get_tpu_info()
        cap = int(getattr(info, "vmem_capacity_bytes", cap))
    except Exception:
        pass
    return max(32 * 1024 * 1024, min(cap * 3 // 4, 112 * 1024 * 1024))


VMEM_LIMIT = _default_vmem_limit()


def _pick_tile(dim, preferred, align):
    """Largest multiple of `align` that divides dim and is <= preferred,
    otherwise the full dim (no tiling).  Keeps lane tiles at 128-multiples and
    sublane tiles at 8-multiples so stores stay unmasked / lane-dense."""
    if dim <= preferred:
        return dim
    t = (preferred // align) * align
    while t >= align:
        if dim % t == 0:
            return t
        t -= align
    return dim


def _heads_per_group(num_heads, dh):
    """Process heads in groups whose lane width is >=128 (or the full H)."""
    if dh >= 128:
        return 1
    g = min(num_heads, max(1, 128 // dh))
    while num_heads % g != 0:
        g -= 1
    return g


# ----------------------------- dense (matmul) ------------------------------ #

def _dense_kernel(x_ref, w_ref, b_ref, o_ref, acc_ref, *, activation):
    k = pl.program_id(2)

    @pl.when(k == 0)
    def _():
        acc_ref[...] = jnp.zeros(acc_ref.shape, acc_ref.dtype)

    acc_ref[...] += jnp.dot(x_ref[...], w_ref[...],
                            preferred_element_type=jnp.float32)

    @pl.when(k == pl.num_programs(2) - 1)
    def _():
        y = acc_ref[...] + b_ref[...].astype(jnp.float32)
        if activation == "gelu":
            # TODO(synk): HF BERT uses erf-GELU; tanh approximation used here
            # for robust Mosaic lowering (numerically very close).
            y = jax.nn.gelu(y, approximate=True)
        o_ref[...] = y.astype(o_ref.dtype)


def dense(x, w, b, activation=None, out_dtype=jnp.bfloat16):
    """x: [M, K] (bf16), w: [K, N] (bf16), b: [N] (f32) -> [M, N]."""
    m, kdim = x.shape
    n = w.shape[1]
    tm = _pick_tile(m, TM, 8)
    tn = _pick_tile(n, TN, 128)
    tk = _pick_tile(kdim, TK, 128)
    grid = (m // tm, n // tn, kdim // tk)
    return pl.pallas_call(
        functools.partial(_dense_kernel, activation=activation),
        out_shape=jax.ShapeDtypeStruct((m, n), out_dtype),
        grid=grid,
        in_specs=[
            pl.BlockSpec((tm, tk), lambda i, j, k: (i, k)),
            pl.BlockSpec((tk, tn), lambda i, j, k: (k, j)),
            pl.BlockSpec((1, tn), lambda i, j, k: (0, j)),
        ],
        out_specs=pl.BlockSpec((tm, tn), lambda i, j, k: (i, j)),
        scratch_shapes=[pltpu.VMEM((tm, tn), jnp.float32)],
        compiler_params=pltpu.CompilerParams(
            dimension_semantics=("parallel", "parallel", "arbitrary"),
            vmem_limit_bytes=VMEM_LIMIT),
    )(x, w, b.reshape(1, n))


# ----------------------- fused QKV projection (one matmul) ------------------ #

def _dense_qkv_kernel(x_ref, w_ref, b_ref, o_ref, acc_ref):
    k = pl.program_id(2)

    @pl.when(k == 0)
    def _():
        acc_ref[...] = jnp.zeros(acc_ref.shape, acc_ref.dtype)

    acc_ref[...] += jnp.dot(x_ref[...], w_ref[0],
                            preferred_element_type=jnp.float32)

    @pl.when(k == pl.num_programs(2) - 1)
    def _():
        o_ref[0] = (acc_ref[...] + b_ref[0].astype(jnp.float32)).astype(o_ref.dtype)


def dense_qkv(x, w_qkv, b_qkv, out_dtype=jnp.bfloat16):
    """x: [M, H]; w_qkv: [3, H, H] (Q|K|V stacked, 1/sqrt(dh) folded into Q);
    b_qkv: [3, 1, H].  Output: [3, M, H] so attention indexes Q/K/V on a
    leading axis and every block stays lane-dense at width H."""
    m, kdim = x.shape
    h = w_qkv.shape[2]
    tm = _pick_tile(m, TM, 8)
    tk = _pick_tile(kdim, TK, 128)
    grid = (m // tm, 3, kdim // tk)
    return pl.pallas_call(
        _dense_qkv_kernel,
        out_shape=jax.ShapeDtypeStruct((3, m, h), out_dtype),
        grid=grid,
        in_specs=[
            pl.BlockSpec((tm, tk), lambda i, j, k: (i, k)),
            pl.BlockSpec((1, tk, h), lambda i, j, k: (j, k, 0)),
            pl.BlockSpec((1, 1, h), lambda i, j, k: (j, 0, 0)),
        ],
        out_specs=pl.BlockSpec((1, tm, h), lambda i, j, k: (j, i, 0)),
        scratch_shapes=[pltpu.VMEM((tm, h), jnp.float32)],
        compiler_params=pltpu.CompilerParams(
            dimension_semantics=("parallel", "parallel", "arbitrary"),
            vmem_limit_bytes=VMEM_LIMIT),
    )(x, w_qkv, b_qkv)


# ------------------ dense + residual-add + LayerNorm (fused) ---------------- #

def _dense_res_ln_kernel(x_ref, w_ref, b_ref, r_ref, g_ref, bb_ref, o_ref,
                         acc_ref, *, eps):
    k = pl.program_id(1)

    @pl.when(k == 0)
    def _():
        acc_ref[...] = jnp.zeros(acc_ref.shape, acc_ref.dtype)

    acc_ref[...] += jnp.dot(x_ref[...], w_ref[...],
                            preferred_element_type=jnp.float32)

    @pl.when(k == pl.num_programs(1) - 1)
    def _():
        y = (acc_ref[...] + b_ref[...].astype(jnp.float32)
             + r_ref[...].astype(jnp.float32))
        mean = jnp.mean(y, axis=-1, keepdims=True)
        var = jnp.mean((y - mean) ** 2, axis=-1, keepdims=True)
        inv = jax.lax.rsqrt(var + eps)
        o_ref[...] = ((y - mean) * inv * g_ref[...] + bb_ref[...]).astype(o_ref.dtype)


def dense_add_ln(x, w, b, residual, gamma, beta, eps=1e-12,
                 out_dtype=jnp.bfloat16):
    """LayerNorm(x @ w + b + residual).  N must be the full hidden width so the
    LN reduction sees the whole row (out block width = H, lane-dense)."""
    m, kdim = x.shape
    n = w.shape[1]
    tm = _pick_tile(m, TM, 8)
    tk = _pick_tile(kdim, TK, 128)
    grid = (m // tm, kdim // tk)
    return pl.pallas_call(
        functools.partial(_dense_res_ln_kernel, eps=eps),
        out_shape=jax.ShapeDtypeStruct((m, n), out_dtype),
        grid=grid,
        in_specs=[
            pl.BlockSpec((tm, tk), lambda i, k: (i, k)),
            pl.BlockSpec((tk, n), lambda i, k: (k, 0)),
            pl.BlockSpec((1, n), lambda i, k: (0, 0)),
            pl.BlockSpec((tm, n), lambda i, k: (i, 0)),
            pl.BlockSpec((1, n), lambda i, k: (0, 0)),
            pl.BlockSpec((1, n), lambda i, k: (0, 0)),
        ],
        out_specs=pl.BlockSpec((tm, n), lambda i, k: (i, 0)),
        scratch_shapes=[pltpu.VMEM((tm, n), jnp.float32)],
        compiler_params=pltpu.CompilerParams(
            dimension_semantics=("parallel", "arbitrary"),
            vmem_limit_bytes=VMEM_LIMIT),
    )(x, w, b.reshape(1, n), residual, gamma.reshape(1, n), beta.reshape(1, n))


# --------------------------- standalone LayerNorm --------------------------- #

def _ln_kernel(x_ref, g_ref, b_ref, o_ref, *, eps):
    x = x_ref[...].astype(jnp.float32)
    mean = jnp.mean(x, axis=-1, keepdims=True)
    var = jnp.mean((x - mean) ** 2, axis=-1, keepdims=True)
    inv = jax.lax.rsqrt(var + eps)
    o_ref[...] = ((x - mean) * inv * g_ref[...] + b_ref[...]).astype(o_ref.dtype)


def layernorm(x, gamma, beta, eps=1e-12, out_dtype=jnp.bfloat16):
    m, h = x.shape
    tm = _pick_tile(m, TM_LN, 8)
    grid = (m // tm,)
    return pl.pallas_call(
        functools.partial(_ln_kernel, eps=eps),
        out_shape=jax.ShapeDtypeStruct((m, h), out_dtype),
        grid=grid,
        in_specs=[pl.BlockSpec((tm, h), lambda i: (i, 0)),
                  pl.BlockSpec((1, h), lambda i: (0, 0)),
                  pl.BlockSpec((1, h), lambda i: (0, 0))],
        out_specs=pl.BlockSpec((tm, h), lambda i: (i, 0)),
        compiler_params=pltpu.CompilerParams(
            dimension_semantics=("parallel",),
            vmem_limit_bytes=VMEM_LIMIT),
    )(x, gamma.reshape(1, h), beta.reshape(1, h))


# --------------------------- flash-style attention -------------------------- #

def _attn_kernel(q_ref, k_ref, v_ref, mask_ref, o_ref, m_sc, l_sc, acc_sc,
                 *, num_heads, heads_per_group):
    ki = pl.program_id(2)
    nk = pl.num_programs(2)
    tq = q_ref.shape[2]
    tk = k_ref.shape[2]
    h = q_ref.shape[3]
    dh = h // num_heads
    gw = heads_per_group * dh

    @pl.when(ki == 0)
    def _():
        m_sc[...] = jnp.full(m_sc.shape, -1e30, jnp.float32)
        l_sc[...] = jnp.zeros(l_sc.shape, jnp.float32)
        acc_sc[...] = jnp.zeros(acc_sc.shape, jnp.float32)

    # Additive mask broadcast hoisted: done once per KV step, reused by heads.
    mask_b = jnp.broadcast_to(mask_ref[0].astype(jnp.float32), (tq, tk))

    q = q_ref[0, 0]          # (tq, H) bf16; 1/sqrt(dh) already folded into Wq
    kt = k_ref[0, 0]         # (tk, H) bf16
    vt = v_ref[0, 0]         # (tk, H) bf16

    # Heads processed in >=128-lane groups so acc/o writes are lane-aligned.
    for g in range(num_heads // heads_per_group):
        pv_parts, alpha_parts = [], []
        for hh in range(heads_per_group):
            head = g * heads_per_group + hh
            hs = slice(head * dh, (head + 1) * dh)
            s = jax.lax.dot_general(
                q[:, hs], kt[:, hs], (((1,), (1,)), ((), ())),
                preferred_element_type=jnp.float32) + mask_b      # (tq, tk) f32
            m_prev = m_sc[head]                                   # (tq, 1)
            m_new = jnp.maximum(m_prev, jnp.max(s, axis=-1, keepdims=True))
            alpha = jnp.exp(m_prev - m_new)
            p = jnp.exp(s - m_new)
            l_sc[head] = alpha * l_sc[head] + jnp.sum(p, axis=-1, keepdims=True)
            m_sc[head] = m_new
            pv_parts.append(jnp.dot(p.astype(jnp.bfloat16), vt[:, hs],
                                    preferred_element_type=jnp.float32))
            alpha_parts.append(jnp.broadcast_to(alpha, (tq, dh)))
        pv_g = pv_parts[0] if heads_per_group == 1 else jnp.concatenate(pv_parts, -1)
        al_g = alpha_parts[0] if heads_per_group == 1 else jnp.concatenate(alpha_parts, -1)
        gs = slice(g * gw, (g + 1) * gw)
        acc_sc[:, gs] = al_g * acc_sc[:, gs] + pv_g

    @pl.when(ki == nk - 1)
    def _():
        inv_parts = [jnp.broadcast_to(pl.reciprocal(l_sc[head], approx=True),
                                      (tq, dh)) for head in range(num_heads)]
        inv_full = inv_parts[0] if num_heads == 1 else jnp.concatenate(inv_parts, -1)
        # single full-width, lane-dense store of the normalized output tile
        o_ref[0] = (acc_sc[...] * inv_full).astype(o_ref.dtype)


def attention(qkv, add_mask, num_heads, out_dtype=jnp.bfloat16):
    """qkv: [3, B, S, H] (Q|K|V on the leading axis), add_mask: [B, 1, S]."""
    _, b, s, h = qkv.shape
    dh = h // num_heads
    hpg = _heads_per_group(num_heads, dh)
    tq = _pick_tile(s, TQ, 8)
    tk = _pick_tile(s, TKV, 128)
    grid = (b, s // tq, s // tk)
    # TODO(synk): scalar-prefetch of per-sequence valid lengths could skip
    # fully-padded KV tiles; the additive mask alone is used here.
    return pl.pallas_call(
        functools.partial(_attn_kernel, num_heads=num_heads,
                          heads_per_group=hpg),
        out_shape=jax.ShapeDtypeStruct((b, s, h), out_dtype),
        grid=grid,
        in_specs=[
            pl.BlockSpec((1, 1, tq, h), lambda bi, qi, ki: (0, bi, qi, 0)),
            pl.BlockSpec((1, 1, tk, h), lambda bi, qi, ki: (1, bi, ki, 0)),
            pl.BlockSpec((1, 1, tk, h), lambda bi, qi, ki: (2, bi, ki, 0)),
            pl.BlockSpec((1, 1, tk), lambda bi, qi, ki: (bi, 0, ki)),
        ],
        out_specs=pl.BlockSpec((1, tq, h), lambda bi, qi, ki: (bi, qi, 0)),
        scratch_shapes=[
            pltpu.VMEM((num_heads, tq, 1), jnp.float32),   # running max m
            pltpu.VMEM((num_heads, tq, 1), jnp.float32),   # running sum l
            pltpu.VMEM((tq, h), jnp.float32),              # output accumulator
        ],
        compiler_params=pltpu.CompilerParams(
            dimension_semantics=("parallel", "parallel", "arbitrary"),
            vmem_limit_bytes=VMEM_LIMIT),
    )(qkv, qkv, qkv, add_mask)


# ------------------------------ Model (glue) -------------------------------- #

def init_params(key, *, vocab=100, hidden=32, num_heads=4, intermediate=64,
                num_layers=2, max_pos=16, type_vocab=2):
    dh = hidden // num_heads
    scale = 1.0 / (dh ** 0.5)

    def nrm(k, shape):
        return 0.02 * jax.random.normal(k, shape, dtype=jnp.float32)

    keys = jax.random.split(key, 4 + num_layers)
    params = {
        "word_emb": nrm(keys[0], (vocab, hidden)),
        "pos_emb": nrm(keys[1], (max_pos, hidden)),
        "type_emb": nrm(keys[2], (type_vocab, hidden)),
        "emb_ln_g": jnp.ones((hidden,), jnp.float32),
        "emb_ln_b": jnp.zeros((hidden,), jnp.float32),
        "num_heads": num_heads,
        "layers": [],
    }
    for li in range(num_layers):
        lk = jax.random.split(keys[4 + li], 8)
        wq = nrm(lk[0], (hidden, hidden)) * scale   # fold 1/sqrt(dh) into Wq
        wk = nrm(lk[1], (hidden, hidden))
        wv = nrm(lk[2], (hidden, hidden))
        layer = {
            # fused QKV projection weights, stacked on a leading axis
            "w_qkv": jnp.stack([wq, wk, wv], axis=0).astype(jnp.bfloat16),
            "b_qkv": jnp.zeros((3, 1, hidden), jnp.float32),
            "wo": nrm(lk[3], (hidden, hidden)).astype(jnp.bfloat16),
            "bo": jnp.zeros((hidden,), jnp.float32),
            "ln1_g": jnp.ones((hidden,), jnp.float32),
            "ln1_b": jnp.zeros((hidden,), jnp.float32),
            "w1": nrm(lk[4], (hidden, intermediate)).astype(jnp.bfloat16),
            "b1": jnp.zeros((intermediate,), jnp.float32),
            "w2": nrm(lk[5], (intermediate, hidden)).astype(jnp.bfloat16),
            "b2": jnp.zeros((hidden,), jnp.float32),
            "ln2_g": jnp.ones((hidden,), jnp.float32),
            "ln2_b": jnp.zeros((hidden,), jnp.float32),
        }
        params["layers"].append(layer)
    return params


def bert_layer(p, xf, add_mask, num_heads, b, s, *, final):
    """xf: [B*S, H] bf16 residual stream.
    TODO(synk): residual stream kept in bf16 between kernels (f32 math inside
    each kernel); tiny precision delta vs an f32 residual stream."""
    m, h = xf.shape

    qkv = dense_qkv(xf, p["w_qkv"], p["b_qkv"])               # [3, B*S, H] bf16
    ctx = attention(qkv.reshape(3, b, s, h), add_mask, num_heads)  # [B, S, H]

    # wo projection with residual-add + LayerNorm fused into its epilogue
    x1 = dense_add_ln(ctx.reshape(m, h), p["wo"], p["bo"], xf,
                      p["ln1_g"], p["ln1_b"])

    hmid = dense(x1, p["w1"], p["b1"], activation="gelu")     # [B*S, 4H]
    # w2 projection with residual-add + LayerNorm fused into its epilogue
    x2 = dense_add_ln(hmid, p["w2"], p["b2"], x1, p["ln2_g"], p["ln2_b"],
                      out_dtype=jnp.float32 if final else jnp.bfloat16)
    return x2


def model_forward(params, input_ids, attention_mask):
    """Equivalent of ModelWrapper.forward: returns last_hidden_state [B, S, H]."""
    b, s = input_ids.shape
    h = params["word_emb"].shape[1]

    # Embedding gather/sum stays in plain JAX (tiny, gather-shaped); LN in Pallas.
    emb = (params["word_emb"][input_ids]
           + params["pos_emb"][jnp.arange(s)][None, :, :]
           + params["type_emb"][0][None, None, :])
    x = layernorm(emb.reshape(b * s, h), params["emb_ln_g"], params["emb_ln_b"])

    # additive attention mask: 0 where attended, -1e4 where padded; [B, 1, S]
    add_mask = ((1.0 - attention_mask.astype(jnp.float32)) * -10000.0)[:, None, :]

    num_layers = len(params["layers"])
    for li, layer in enumerate(params["layers"]):
        x = bert_layer(layer, x, add_mask, params["num_heads"], b, s,
                       final=(li == num_layers - 1))
    return x.reshape(b, s, h)  # last_hidden_state, f32


# --------------------------------- main ------------------------------------ #

if __name__ == "__main__":
    key = jax.random.PRNGKey(0)
    pkey, ikey = jax.random.split(key)

    B, S = 2, 8
    VOCAB, HIDDEN = 100, 32

    params = init_params(pkey, vocab=VOCAB, hidden=HIDDEN, num_heads=4,
                         intermediate=64, num_layers=2, max_pos=16)

    input_ids = jax.random.randint(ikey, (B, S), 0, VOCAB, dtype=jnp.int32)
    attention_mask = jnp.array(
        [[1, 1, 1, 1, 1, 1, 1, 1],
         [1, 1, 1, 1, 1, 1, 0, 0]], dtype=jnp.int32)  # second example padded

    fwd = jax.jit(lambda ids, mask: model_forward(params, ids, mask))
    last_hidden_state = fwd(input_ids, attention_mask)
    jax.block_until_ready(last_hidden_state)

    assert last_hidden_state.shape == (B, S, HIDDEN)
    assert last_hidden_state.dtype == jnp.float32
    print("KERNEL_OK")
</pallas_src>

<mosaic_0001>
module attributes {stable_mosaic.version = 11 : i64} {
  func.func @_ln_kernel(%arg0: i32, %arg1: memref<16x32xf32, #tpu.memory_space<vmem>>, %arg2: memref<1x32xf32, #tpu.memory_space<vmem>>, %arg3: memref<1x32xf32, #tpu.memory_space<vmem>>, %arg4: memref<16x32xbf16, #tpu.memory_space<vmem>>) attributes {dimension_semantics = [#tpu.dimension_semantics<parallel>], iteration_bounds = array<i64: 1>, scalar_prefetch = 0 : i64, scratch_operands = 0 : i64, tpu.core_type = #tpu.core_type<tc>, window_params = [{transform_indices = @transform_0, window_bounds = array<i64: 16, 32>}, {pipeline_mode = #tpu.pipeline_mode<synchronous>, transform_indices = @transform_1, window_bounds = array<i64: 1, 32>}, {pipeline_mode = #tpu.pipeline_mode<synchronous>, transform_indices = @transform_2, window_bounds = array<i64: 1, 32>}, {transform_indices = @transform_3, window_bounds = array<i64: 16, 32>}]} {
    %c0 = arith.constant 0 : index
    %c0_0 = arith.constant 0 : index
    %0 = vector.load %arg1[%c0, %c0_0] : memref<16x32xf32, #tpu.memory_space<vmem>>, vector<16x32xf32>
    %cst = arith.constant dense<0.000000e+00> : vector<16xf32>
    %1 = vector.multi_reduction <add>, %0, %cst [1] : vector<16x32xf32> to vector<16xf32>
    %2 = vector.shape_cast %1 : vector<16xf32> to vector<16x1xf32>
    %cst_1 = arith.constant 3.200000e+01 : f32
    %3 = vector.broadcast %cst_1 : f32 to vector<16x1xf32>
    %4 = arith.divf %2, %3 : vector<16x1xf32>
    %5 = vector.broadcast %4 : vector<16x1xf32> to vector<16x32xf32>
    %6 = arith.subf %0, %5 : vector<16x32xf32>
    %7 = arith.mulf %6, %6 : vector<16x32xf32>
    %cst_2 = arith.constant dense<0.000000e+00> : vector<16xf32>
    %8 = vector.multi_reduction <add>, %7, %cst_2 [1] : vector<16x32xf32> to vector<16xf32>
    %9 = vector.shape_cast %8 : vector<16xf32> to vector<16x1xf32>
    %cst_3 = arith.constant 3.200000e+01 : f32
    %10 = vector.broadcast %cst_3 : f32 to vector<16x1xf32>
    %11 = arith.divf %9, %10 : vector<16x1xf32>
    %cst_4 = arith.constant 9.99999996E-13 : f32
    %12 = vector.broadcast %cst_4 : f32 to vector<16x1xf32>
    %13 = arith.addf %11, %12 : vector<16x1xf32>
    %14 = math.rsqrt %13 : vector<16x1xf32>
    %15 = vector.broadcast %4 : vector<16x1xf32> to vector<16x32xf32>
    %16 = arith.subf %0, %15 : vector<16x32xf32>
    %17 = vector.broadcast %14 : vector<16x1xf32> to vector<16x32xf32>
    %18 = arith.mulf %16, %17 : vector<16x32xf32>
    %c0_5 = arith.constant 0 : index
    %c0_6 = arith.constant 0 : index
    %19 = vector.load %arg2[%c0_5, %c0_6] : memref<1x32xf32, #tpu.memory_space<vmem>>, vector<1x32xf32>
    %20 = vector.broadcast %19 : vector<1x32xf32> to vector<16x32xf32>
    %21 = arith.mulf %18, %20 : vector<16x32xf32>
    %c0_7 = arith.constant 0 : index
    %c0_8 = arith.constant 0 : index
    %22 = vector.load %arg3[%c0_7, %c0_8] : memref<1x32xf32, #tpu.memory_space<vmem>>, vector<1x32xf32>
    %23 = vector.broadcast %22 : vector<1x32xf32> to vector<16x32xf32>
    %24 = arith.addf %21, %23 : vector<16x32xf32>
    %25 = arith.truncf %24 : vector<16x32xf32> to vector<16x32xbf16>
    %c0_9 = arith.constant 0 : index
    %c0_10 = arith.constant 0 : index
    %26 = vector.load %arg4[%c0_9, %c0_10] : memref<16x32xbf16, #tpu.memory_space<vmem>>, vector<16x32xbf16>
    tpu.vector_store %arg4[%c0_9, %c0_10], %25 {strides = array<i32>} : memref<16x32xbf16, #tpu.memory_space<vmem>>, vector<16x32xbf16>,
    return
  }
  func.func @transform_0(%arg0: i32) -> (i32, i32) {
    %c0_i32 = arith.constant 0 : i32
    %c0_i32_0 = arith.constant 0 : i32
    return %arg0, %c0_i32 : i32, i32
  }
  func.func @transform_1(%arg0: i32) -> (i32, i32) {
    %c0_i32 = arith.constant 0 : i32
    %c0_i32_0 = arith.constant 0 : i32
    %c0_i32_1 = arith.constant 0 : i32
    return %c0_i32, %c0_i32_0 : i32, i32
  }
  func.func @transform_2(%arg0: i32) -> (i32, i32) {
    %c0_i32 = arith.constant 0 : i32
    %c0_i32_0 = arith.constant 0 : i32
    %c0_i32_1 = arith.constant 0 : i32
    return %c0_i32, %c0_i32_0 : i32, i32
  }
  func.func @transform_3(%arg0: i32) -> (i32, i32) {
    %c0_i32 = arith.constant 0 : i32
    %c0_i32_0 = arith.constant 0 : i32
    return %arg0, %c0_i32 : i32, i32
  }
}

module attributes {stable_mosaic.version = 11 : i64} {
  func.func @_dense_qkv_kernel(%arg0: i32, %arg1: i32, %arg2: i32, %arg3: memref<16x32xbf16, #tpu.memory_space<vmem>>, %arg4: memref<1x32x32xbf16, #tpu.memory_space<vmem>>, %arg5: memref<1x1x32xf32, #tpu.memory_space<vmem>>, %arg6: memref<1x16x32xbf16, #tpu.memory_space<vmem>>, %arg7: memref<16x32xf32, #tpu.memory_space<vmem>>) attributes {dimension_semantics = [#tpu.dimension_semantics<parallel>, #tpu.dimension_semantics<parallel>, #tpu.dimension_semantics<arbitrary>], iteration_bounds = array<i64: 1, 3, 1>, scalar_prefetch = 0 : i64, scratch_operands = 1 : i64, tpu.core_type = #tpu.core_type<tc>, window_params = [{transform_indices = @transform_0, window_bounds = array<i64: 16, 32>}, {transform_indices = @transform_1, window_bounds = array<i64: 1, 32, 32>}, {transform_indices = @transform_2, window_bounds = array<i64: 1, 1, 32>}, {transform_indices = @transform_3, window_bounds = array<i64: 1, 16, 32>}]} {
    %c0_i32 = arith.constant 0 : i32
    %0 = arith.cmpi eq, %arg2, %c0_i32 : i32
    %1 = arith.extui %0 : i1 to i32
    %c0_i32_0 = arith.constant 0 : i32
    %2 = arith.cmpi ne, %1, %c0_i32_0 : i32
    scf.if %2 {
      %cst_11 = arith.constant 0.000000e+00 : f32
      %13 = vector.broadcast %cst_11 : f32 to vector<16x32xf32>
      %c0_12 = arith.constant 0 : index
      %c0_13 = arith.constant 0 : index
      %14 = vector.load %arg7[%c0_12, %c0_13] : memref<16x32xf32, #tpu.memory_space<vmem>>, vector<16x32xf32>
      tpu.vector_store %arg7[%c0_12, %c0_13], %13 {strides = array<i32>} : memref<16x32xf32, #tpu.memory_space<vmem>>, vector<16x32xf32>,
    } else {
    }
    %c0 = arith.constant 0 : index
    %c0_1 = arith.constant 0 : index
    %3 = vector.load %arg7[%c0, %c0_1] : memref<16x32xf32, #tpu.memory_space<vmem>>, vector<16x32xf32>
    %c0_2 = arith.constant 0 : index
    %c0_3 = arith.constant 0 : index
    %4 = vector.load %arg3[%c0_2, %c0_3] : memref<16x32xbf16, #tpu.memory_space<vmem>>, vector<16x32xbf16>
    %c0_4 = arith.constant 0 : index
    %c0_5 = arith.constant 0 : index
    %c0_6 = arith.constant 0 : index
    %5 = vector.load %arg4[%c0_4, %c0_5, %c0_6] : memref<1x32x32xbf16, #tpu.memory_space<vmem>>, vector<1x32x32xbf16>
    %6 = vector.shape_cast %5 : vector<1x32x32xbf16> to vector<32x32xbf16>
    %cst = arith.constant dense<0.000000e+00> : vector<16x32xf32>
    %7 = tpu.matmul %4, %6, %cst {dimension_numbers = #tpu.dot_dimension_numbers<[1], [0], [0], [1], [0, 0, 1, 1], [], []>} : vector<16x32xbf16>, vector<32x32xbf16>, vector<16x32xf32> -> vector<16x32xf32>
    %8 = arith.addf %3, %7 : vector<16x32xf32>
    %c0_7 = arith.constant 0 : index
    %c0_8 = arith.constant 0 : index
    %9 = vector.load %arg7[%c0_7, %c0_8] : memref<16x32xf32, #tpu.memory_space<vmem>>, vector<16x32xf32>
    tpu.vector_store %arg7[%c0_7, %c0_8], %8 {strides = array<i32>} : memref<16x32xf32, #tpu.memory_space<vmem>>, vector<16x32xf32>,
    %c0_i32_9 = arith.constant 0 : i32
    %10 = arith.cmpi eq, %arg2, %c0_i32_9 : i32
    %11 = arith.extui %10 : i1 to i32
    %c0_i32_10 = arith.constant 0 : i32
    %12 = arith.cmpi ne, %11, %c0_i32_10 : i32
    scf.if %12 {
      %c0_11 = arith.constant 0 : index
      %c0_12 = arith.constant 0 : index
      %13 = vector.load %arg7[%c0_11, %c0_12] : memref<16x32xf32, #tpu.memory_space<vmem>>, vector<16x32xf32>
      %c0_13 = arith.constant 0 : index
      %c0_14 = arith.constant 0 : index
      %c0_15 = arith.constant 0 : index
      %14 = vector.load %arg5[%c0_13, %c0_14, %c0_15] : memref<1x1x32xf32, #tpu.memory_space<vmem>>, vector<1x1x32xf32>
      %15 = vector.shape_cast %14 : vector<1x1x32xf32> to vector<1x32xf32>
      %16 = vector.broadcast %15 : vector<1x32xf32> to vector<16x32xf32>
      %17 = arith.addf %13, %16 : vector<16x32xf32>
      %18 = arith.truncf %17 : vector<16x32xf32> to vector<16x32xbf16>
      %c0_16 = arith.constant 0 : index
      %c0_17 = arith.constant 0 : index
      %c0_18 = arith.constant 0 : index
      %19 = vector.load %arg6[%c0_16, %c0_17, %c0_18] : memref<1x16x32xbf16, #tpu.memory_space<vmem>>, vector<1x16x32xbf16>
      %20 = vector.shape_cast %19 : vector<1x16x32xbf16> to vector<16x32xbf16>
      %21 = vector.shape_cast %18 : vector<16x32xbf16> to vector<1x16x32xbf16>
      tpu.vector_store %arg6[%c0_16, %c0_17, %c0_18], %21 {strides = array<i32>} : memref<1x16x32xbf16, #tpu.memory_space<vmem>>, vector<1x16x32xbf16>,
    } else {
    }
    return
  }
  func.func @transform_0(%arg0: i32, %arg1: i32, %arg2: i32) -> (i32, i32) {
    %c0_i32 = arith.constant 0 : i32
    return %arg0, %arg2 : i32, i32
  }
  func.func @transform_1(%arg0: i32, %arg1: i32, %arg2: i32) -> (i32, i32, i32) {
    %c0_i32 = arith.constant 0 : i32
    %c0_i32_0 = arith.constant 0 : i32
    return %arg1, %arg2, %c0_i32 : i32, i32, i32
  }
  func.func @transform_2(%arg0: i32, %arg1: i32, %arg2: i32) -> (i32, i32, i32) {
    %c0_i32 = arith.constant 0 : i32
    %c0_i32_0 = arith.constant 0 : i32
    %c0_i32_1 = arith.constant 0 : i32
    return %arg1, %c0_i32, %c0_i32_0 : i32, i32, i32
  }
  func.func @transform_3(%arg0: i32, %arg1: i32, %arg2: i32) -> (i32, i32, i32) {
    %c0_i32 = arith.constant 0 : i32
    %c0_i32_0 = arith.constant 0 : i32
    return %arg1, %arg0, %c0_i32 : i32, i32, i32
  }
}

module attributes {stable_mosaic.version = 11 : i64} {
  func.func @_dense_res_ln_kernel(%arg0: i32, %arg1: i32, %arg2: memref<16x32xbf16, #tpu.memory_space<vmem>>, %arg3: memref<32x32xbf16, #tpu.memory_space<vmem>>, %arg4: memref<1x32xf32, #tpu.memory_space<vmem>>, %arg5: memref<16x32xbf16, #tpu.memory_space<vmem>>, %arg6: memref<1x32xf32, #tpu.memory_space<vmem>>, %arg7: memref<1x32xf32, #tpu.memory_space<vmem>>, %arg8: memref<16x32xbf16, #tpu.memory_space<vmem>>, %arg9: memref<16x32xf32, #tpu.memory_space<vmem>>) attributes {dimension_semantics = [#tpu.dimension_semantics<parallel>, #tpu.dimension_semantics<arbitrary>], iteration_bounds = array<i64: 1, 1>, scalar_prefetch = 0 : i64, scratch_operands = 1 : i64, tpu.core_type = #tpu.core_type<tc>, window_params = [{transform_indices = @transform_0, window_bounds = array<i64: 16, 32>}, {transform_indices = @transform_1, window_bounds = array<i64: 32, 32>}, {pipeline_mode = #tpu.pipeline_mode<synchronous>, transform_indices = @transform_2, window_bounds = array<i64: 1, 32>}, {transform_indices = @transform_3, window_bounds = array<i64: 16, 32>}, {pipeline_mode = #tpu.pipeline_mode<synchronous>, transform_indices = @transform_4, window_bounds = array<i64: 1, 32>}, {pipeline_mode = #tpu.pipeline_mode<synchronous>, transform_indices = @transform_5, window_bounds = array<i64: 1, 32>}, {transform_indices = @transform_6, window_bounds = array<i64: 16, 32>}]} {
    %c0_i32 = arith.constant 0 : i32
    %0 = arith.cmpi eq, %arg1, %c0_i32 : i32
    %1 = arith.extui %0 : i1 to i32
    %c0_i32_0 = arith.constant 0 : i32
    %2 = arith.cmpi ne, %1, %c0_i32_0 : i32
    scf.if %2 {
      %cst_10 = arith.constant 0.000000e+00 : f32
      %12 = vector.broadcast %cst_10 : f32 to vector<16x32xf32>
      %c0_11 = arith.constant 0 : index
      %c0_12 = arith.constant 0 : index
      %13 = vector.load %arg9[%c0_11, %c0_12] : memref<16x32xf32, #tpu.memory_space<vmem>>, vector<16x32xf32>
      tpu.vector_store %arg9[%c0_11, %c0_12], %12 {strides = array<i32>} : memref<16x32xf32, #tpu.memory_space<vmem>>, vector<16x32xf32>,
    } else {
    }
    %c0 = arith.constant 0 : index
    %c0_1 = arith.constant 0 : index
    %3 = vector.load %arg9[%c0, %c0_1] : memref<16x32xf32, #tpu.memory_space<vmem>>, vector<16x32xf32>
    %c0_2 = arith.constant 0 : index
    %c0_3 = arith.constant 0 : index
    %4 = vector.load %arg2[%c0_2, %c0_3] : memref<16x32xbf16, #tpu.memory_space<vmem>>, vector<16x32xbf16>
    %c0_4 = arith.constant 0 : index
    %c0_5 = arith.constant 0 : index
    %5 = vector.load %arg3[%c0_4, %c0_5] : memref<32x32xbf16, #tpu.memory_space<vmem>>, vector<32x32xbf16>
    %cst = arith.constant dense<0.000000e+00> : vector<16x32xf32>
    %6 = tpu.matmul %4, %5, %cst {dimension_numbers = #tpu.dot_dimension_numbers<[1], [0], [0], [1], [0, 0, 1, 1], [], []>} : vector<16x32xbf16>, vector<32x32xbf16>, vector<16x32xf32> -> vector<16x32xf32>
    %7 = arith.addf %3, %6 : vector<16x32xf32>
    %c0_6 = arith.constant 0 : index
    %c0_7 = arith.constant 0 : index
    %8 = vector.load %arg9[%c0_6, %c0_7] : memref<16x32xf32, #tpu.memory_space<vmem>>, vector<16x32xf32>
    tpu.vector_store %arg9[%c0_6, %c0_7], %7 {strides = array<i32>} : memref<16x32xf32, #tpu.memory_space<vmem>>, vector<16x32xf32>,
    %c0_i32_8 = arith.constant 0 : i32
    %9 = arith.cmpi eq, %arg1, %c0_i32_8 : i32
    %10 = arith.extui %9 : i1 to i32
    %c0_i32_9 = arith.constant 0 : i32
    %11 = arith.cmpi ne, %10, %c0_i32_9 : i32
    scf.if %11 {
      %c0_10 = arith.constant 0 : index
      %c0_11 = arith.constant 0 : index
      %12 = vector.load %arg9[%c0_10, %c0_11] : memref<16x32xf32, #tpu.memory_space<vmem>>, vector<16x32xf32>
      %c0_12 = arith.constant 0 : index
      %c0_13 = arith.constant 0 : index
      %13 = vector.load %arg4[%c0_12, %c0_13] : memref<1x32xf32, #tpu.memory_space<vmem>>, vector<1x32xf32>
      %14 = vector.broadcast %13 : vector<1x32xf32> to vector<16x32xf32>
      %15 = arith.addf %12, %14 : vector<16x32xf32>
      %c0_14 = arith.constant 0 : index
      %c0_15 = arith.constant 0 : index
      %16 = vector.load %arg5[%c0_14, %c0_15] : memref<16x32xbf16, #tpu.memory_space<vmem>>, vector<16x32xbf16>
      %17 = arith.extf %16 : vector<16x32xbf16> to vector<16x32xf32>
      %18 = arith.addf %15, %17 : vector<16x32xf32>
      %cst_16 = arith.constant dense<0.000000e+00> : vector<16xf32>
      %19 = vector.multi_reduction <add>, %18, %cst_16 [1] : vector<16x32xf32> to vector<16xf32>
      %20 = vector.shape_cast %19 : vector<16xf32> to vector<16x1xf32>
      %cst_17 = arith.constant 3.200000e+01 : f32
      %21 = vector.broadcast %cst_17 : f32 to vector<16x1xf32>
      %22 = arith.divf %20, %21 : vector<16x1xf32>
      %23 = vector.broadcast %22 : vector<16x1xf32> to vector<16x32xf32>
      %24 = arith.subf %18, %23 : vector<16x32xf32>
      %25 = arith.mulf %24, %24 : vector<16x32xf32>
      %cst_18 = arith.constant dense<0.000000e+00> : vector<16xf32>
      %26 = vector.multi_reduction <add>, %25, %cst_18 [1] : vector<16x32xf32> to vector<16xf32>
      %27 = vector.shape_cast %26 : vector<16xf32> to vector<16x1xf32>
      %cst_19 = arith.constant 3.200000e+01 : f32
      %28 = vector.broadcast %cst_19 : f32 to vector<16x1xf32>
      %29 = arith.divf %27, %28 : vector<16x1xf32>
      %cst_20 = arith.constant 9.99999996E-13 : f32
      %30 = vector.broadcast %cst_20 : f32 to vector<16x1xf32>
      %31 = arith.addf %29, %30 : vector<16x1xf32>
      %32 = math.rsqrt %31 : vector<16x1xf32>
      %33 = vector.broadcast %22 : vector<16x1xf32> to vector<16x32xf32>
      %34 = arith.subf %18, %33 : vector<16x32xf32>
      %35 = vector.broadcast %32 : vector<16x1xf32> to vector<16x32xf32>
      %36 = arith.mulf %34, %35 : vector<16x32xf32>
      %c0_21 = arith.constant 0 : index
      %c0_22 = arith.constant 0 : index
      %37 = vector.load %arg6[%c0_21, %c0_22] : memref<1x32xf32, #tpu.memory_space<vmem>>, vector<1x32xf32>
      %38 = vector.broadcast %37 : vector<1x32xf32> to vector<16x32xf32>
      %39 = arith.mulf %36, %38 : vector<16x32xf32>
      %c0_23 = arith.constant 0 : index
      %c0_24 = arith.constant 0 : index
      %40 = vector.load %arg7[%c0_23, %c0_24] : memref<1x32xf32, #tpu.memory_space<vmem>>, vector<1x32xf32>
      %41 = vector.broadcast %40 : vector<1x32xf32> to vector<16x32xf32>
      %42 = arith.addf %39, %41 : vector<16x32xf32>
      %43 = arith.truncf %42 : vector<16x32xf32> to vector<16x32xbf16>
      %c0_25 = arith.constant 0 : index
      %c0_26 = arith.constant 0 : index
      %44 = vector.load %arg8[%c0_25, %c0_26] : memref<16x32xbf16, #tpu.memory_space<vmem>>, vector<16x32xbf16>
      tpu.vector_store %arg8[%c0_25, %c0_26], %43 {strides = array<i32>} : memref<16x32xbf16, #tpu.memory_space<vmem>>, vector<16x32xbf16>,
    } else {
    }
    return
  }
  func.func @transform_0(%arg0: i32, %arg1: i32) -> (i32, i32) {
    %c0_i32 = arith.constant 0 : i32
    return %arg0, %arg1 : i32, i32
  }
  func.func @transform_1(%arg0: i32, %arg1: i32) -> (i32, i32) {
    %c0_i32 = arith.constant 0 : i32
    %c0_i32_0 = arith.constant 0 : i32
    return %arg1, %c0_i32 : i32, i32
  }
  func.func @transform_2(%arg0: i32, %arg1: i32) -> (i32, i32) {
    %c0_i32 = arith.constant 0 : i32
    %c0_i32_0 = arith.constant 0 : i32
    %c0_i32_1 = arith.constant 0 : i32
    return %c0_i32, %c0_i32_0 : i32, i32
  }
  func.func @transform_3(%arg0: i32, %arg1: i32) -> (i32, i32) {
    %c0_i32 = arith.constant 0 : i32
    %c0_i32_0 = arith.constant 0 : i32
    return %arg0, %c0_i32 : i32, i32
  }
  func.func @transform_4(%arg0: i32, %arg1: i32) -> (i32, i32) {
    %c0_i32 = arith.constant 0 : i32
    %c0_i32_0 = arith.constant 0 : i32
    %c0_i32_1 = arith.constant 0 : i32
    return %c0_i32, %c0_i32_0 : i32, i32
  }
  func.func @transform_5(%arg0: i32, %arg1: i32) -> (i32, i32) {
    %c0_i32 = arith.constant 0 : i32
    %c0_i32_0 = arith.constant 0 : i32
    %c0_i32_1 = arith.constant 0 : i32
    return %c0_i32, %c0_i32_0 : i32, i32
  }
  func.func @transform_6(%arg0: i32, %arg1: i32) -> (i32, i32) {
    %c0_i32 = arith.constant 0 : i32
    %c0_i32_0 = arith.constant 0 : i32
    return %arg0, %c0_i32 : i32, i32
  }
}

module attributes {stable_mosaic.version = 11 : i64} {
  func.func @_attn_kernel(%arg0: i32, %arg1: i32, %arg2: i32, %arg3: memref<1x1x8x32xbf16, #tpu.memory_space<vmem>>, %arg4: memref<1x1x8x32xbf16, #tpu.memory_space<vmem>>, %arg5: memref<1x1x8x32xbf16, #tpu.memory_space<vmem>>, %arg6: memref<1x1x8xf32, #tpu.memory_space<vmem>>, %arg7: memref<1x8x32xbf16, #tpu.memory_space<vmem>>, %arg8: memref<4x8x1xf32, #tpu.memory_space<vmem>>, %arg9: memref<4x8x1xf32, #tpu.memory_space<vmem>>, %arg10: memref<8x32xf32, #tpu.memory_space<vmem>>) attributes {dimension_semantics = [#tpu.dimension_semantics<parallel>, #tpu.dimension_semantics<parallel>, #tpu.dimension_semantics<arbitrary>], iteration_bounds = array<i64: 2, 1, 1>, scalar_prefetch = 0 : i64, scratch_operands = 3 : i64, tpu.core_type = #tpu.core_type<tc>, window_params = [{transform_indices = @transform_0, window_bounds = array<i64: 1, 1, 8, 32>}, {transform_indices = @transform_1, window_bounds = array<i64: 1, 1, 8, 32>}, {transform_indices = @transform_2, window_bounds = array<i64: 1, 1, 8, 32>}, {transform_indices = @transform_3, window_bounds = array<i64: 1, 1, 8>}, {transform_indices = @transform_4, window_bounds = array<i64: 1, 8, 32>}]} {
    %c0_i32 = arith.constant 0 : i32
    %0 = arith.cmpi eq, %arg2, %c0_i32 : i32
    %1 = arith.extui %0 : i1 to i32
    %c0_i32_0 = arith.constant 0 : i32
    %2 = arith.cmpi ne, %1, %c0_i32_0 : i32
    scf.if %2 {
      %cst_81 = arith.constant -1.000000e+30 : f32
      %146 = vector.broadcast %cst_81 : f32 to vector<4x8x1xf32>
      %c0_82 = arith.constant 0 : index
      %c0_83 = arith.constant 0 : index
      %c0_84 = arith.constant 0 : index
      %147 = vector.load %arg8[%c0_82, %c0_83, %c0_84] : memref<4x8x1xf32, #tpu.memory_space<vmem>>, vector<4x8x1xf32>
      tpu.vector_store %arg8[%c0_82, %c0_83, %c0_84], %146 {strides = array<i32>} : memref<4x8x1xf32, #tpu.memory_space<vmem>>, vector<4x8x1xf32>,
      %cst_85 = arith.constant 0.000000e+00 : f32
      %148 = vector.broadcast %cst_85 : f32 to vector<4x8x1xf32>
      %c0_86 = arith.constant 0 : index
      %c0_87 = arith.constant 0 : index
      %c0_88 = arith.constant 0 : index
      %149 = vector.load %arg9[%c0_86, %c0_87, %c0_88] : memref<4x8x1xf32, #tpu.memory_space<vmem>>, vector<4x8x1xf32>
      tpu.vector_store %arg9[%c0_86, %c0_87, %c0_88], %148 {strides = array<i32>} : memref<4x8x1xf32, #tpu.memory_space<vmem>>, vector<4x8x1xf32>,
      %cst_89 = arith.constant 0.000000e+00 : f32
      %150 = vector.broadcast %cst_89 : f32 to vector<8x32xf32>
      %c0_90 = arith.constant 0 : index
      %c0_91 = arith.constant 0 : index
      %151 = vector.load %arg10[%c0_90, %c0_91] : memref<8x32xf32, #tpu.memory_space<vmem>>, vector<8x32xf32>
      tpu.vector_store %arg10[%c0_90, %c0_91], %150 {strides = array<i32>} : memref<8x32xf32, #tpu.memory_space<vmem>>, vector<8x32xf32>,
    } else {
    }
    %c0 = arith.constant 0 : index
    %c0_1 = arith.constant 0 : index
    %c0_2 = arith.constant 0 : index
    %3 = vector.load %arg6[%c0, %c0_1, %c0_2] : memref<1x1x8xf32, #tpu.memory_space<vmem>>, vector<1x1x8xf32>
    %4 = vector.shape_cast %3 : vector<1x1x8xf32> to vector<1x8xf32>
    %5 = vector.shape_cast %4 : vector<1x8xf32> to vector<1x8xf32>
    %6 = vector.broadcast %5 : vector<1x8xf32> to vector<8x8xf32>
    %c0_3 = arith.constant 0 : index
    %c0_4 = arith.constant 0 : index
    %c0_5 = arith.constant 0 : index
    %c0_6 = arith.constant 0 : index
    %7 = vector.load %arg3[%c0_3, %c0_4, %c0_5, %c0_6] : memref<1x1x8x32xbf16, #tpu.memory_space<vmem>>, vector<1x1x8x32xbf16>
    %8 = vector.shape_cast %7 : vector<1x1x8x32xbf16> to vector<8x32xbf16>
    %c0_7 = arith.constant 0 : index
    %c0_8 = arith.constant 0 : index
    %c0_9 = arith.constant 0 : index
    %c0_10 = arith.constant 0 : index
    %9 = vector.load %arg4[%c0_7, %c0_8, %c0_9, %c0_10] : memref<1x1x8x32xbf16, #tpu.memory_space<vmem>>, vector<1x1x8x32xbf16>
    %10 = vector.shape_cast %9 : vector<1x1x8x32xbf16> to vector<8x32xbf16>
    %c0_11 = arith.constant 0 : index
    %c0_12 = arith.constant 0 : index
    %c0_13 = arith.constant 0 : index
    %c0_14 = arith.constant 0 : index
    %11 = vector.load %arg5[%c0_11, %c0_12, %c0_13, %c0_14] : memref<1x1x8x32xbf16, #tpu.memory_space<vmem>>, vector<1x1x8x32xbf16>
    %12 = vector.shape_cast %11 : vector<1x1x8x32xbf16> to vector<8x32xbf16>
    %13 = vector.extract_strided_slice %8 {offsets = [0, 0], sizes = [8, 8], strides = [1, 1]} : vector<8x32xbf16> to vector<8x8xbf16>
    %14 = vector.extract_strided_slice %10 {offsets = [0, 0], sizes = [8, 8], strides = [1, 1]} : vector<8x32xbf16> to vector<8x8xbf16>
    %cst = arith.constant dense<0.000000e+00> : vector<8x8xf32>
    %15 = tpu.matmul %13, %14, %cst {dimension_numbers = #tpu.dot_dimension_numbers<[1], [1], [0], [0], [0, 0, 1, 0], [], []>} : vector<8x8xbf16>, vector<8x8xbf16>, vector<8x8xf32> -> vector<8x8xf32>
    %16 = arith.addf %15, %6 : vector<8x8xf32>
    %c0_15 = arith.constant 0 : index
    %c0_16 = arith.constant 0 : index
    %c0_17 = arith.constant 0 : index
    %17 = vector.load %arg8[%c0_15, %c0_16, %c0_17] : memref<4x8x1xf32, #tpu.memory_space<vmem>>, vector<1x8x1xf32>
    %18 = vector.shape_cast %17 : vector<1x8x1xf32> to vector<8x1xf32>
    %cst_18 = arith.constant dense<0xFF800000> : vector<8xf32>
    %19 = vector.multi_reduction <maximumf>, %16, %cst_18 [1] : vector<8x8xf32> to vector<8xf32>
    %20 = vector.shape_cast %19 : vector<8xf32> to vector<8x1xf32>
    %21 = arith.maximumf %18, %20 : vector<8x1xf32>
    %22 = arith.subf %18, %21 : vector<8x1xf32>
    %23 = math.exp %22 : vector<8x1xf32>
    %24 = vector.broadcast %21 : vector<8x1xf32> to vector<8x8xf32>
    %25 = arith.subf %16, %24 : vector<8x8xf32>
    %26 = math.exp %25 : vector<8x8xf32>
    %c0_19 = arith.constant 0 : index
    %c0_20 = arith.constant 0 : index
    %c0_21 = arith.constant 0 : index
    %27 = vector.load %arg9[%c0_19, %c0_20, %c0_21] : memref<4x8x1xf32, #tpu.memory_space<vmem>>, vector<1x8x1xf32>
    %28 = vector.shape_cast %27 : vector<1x8x1xf32> to vector<8x1xf32>
    %29 = arith.mulf %23, %28 : vector<8x1xf32>
    %cst_22 = arith.constant dense<0.000000e+00> : vector<8xf32>
    %30 = vector.multi_reduction <add>, %26, %cst_22 [1] : vector<8x8xf32> to vector<8xf32>
    %31 = vector.shape_cast %30 : vector<8xf32> to vector<8x1xf32>
    %32 = arith.addf %29, %31 : vector<8x1xf32>
    %c0_23 = arith.constant 0 : index
    %c0_24 = arith.constant 0 : index
    %c0_25 = arith.constant 0 : index
    %33 = vector.load %arg9[%c0_23, %c0_24, %c0_25] : memref<4x8x1xf32, #tpu.memory_space<vmem>>, vector<1x8x1xf32>
    %34 = vector.shape_cast %33 : vector<1x8x1xf32> to vector<8x1xf32>
    %35 = vector.shape_cast %32 : vector<8x1xf32> to vector<1x8x1xf32>
    tpu.vector_store %arg9[%c0_23, %c0_24, %c0_25], %35 {strides = array<i32>} : memref<4x8x1xf32, #tpu.memory_space<vmem>>, vector<1x8x1xf32>,
    %c0_26 = arith.constant 0 : index
    %c0_27 = arith.constant 0 : index
    %c0_28 = arith.constant 0 : index
    %36 = vector.load %arg8[%c0_26, %c0_27, %c0_28] : memref<4x8x1xf32, #tpu.memory_space<vmem>>, vector<1x8x1xf32>
    %37 = vector.shape_cast %36 : vector<1x8x1xf32> to vector<8x1xf32>
    %38 = vector.shape_cast %21 : vector<8x1xf32> to vector<1x8x1xf32>
    tpu.vector_store %arg8[%c0_26, %c0_27, %c0_28], %38 {strides = array<i32>} : memref<4x8x1xf32, #tpu.memory_space<vmem>>, vector<1x8x1xf32>,
    %39 = arith.truncf %26 : vector<8x8xf32> to vector<8x8xbf16>
    %40 = vector.extract_strided_slice %12 {offsets = [0, 0], sizes = [8, 8], strides = [1, 1]} : vector<8x32xbf16> to vector<8x8xbf16>
    %cst_29 = arith.constant dense<0.000000e+00> : vector<8x8xf32>
    %41 = tpu.matmul %39, %40, %cst_29 {dimension_numbers = #tpu.dot_dimension_numbers<[1], [0], [0], [1], [0, 0, 1, 1], [], []>} : vector<8x8xbf16>, vector<8x8xbf16>, vector<8x8xf32> -> vector<8x8xf32>
    %42 = vector.shape_cast %23 : vector<8x1xf32> to vector<8x1xf32>
    %43 = vector.broadcast %42 : vector<8x1xf32> to vector<8x8xf32>
    %44 = vector.extract_strided_slice %8 {offsets = [0, 8], sizes = [8, 8], strides = [1, 1]} : vector<8x32xbf16> to vector<8x8xbf16>
    %45 = vector.extract_strided_slice %10 {offsets = [0, 8], sizes = [8, 8], strides = [1, 1]} : vector<8x32xbf16> to vector<8x8xbf16>
    %cst_30 = arith.constant dense<0.000000e+00> : vector<8x8xf32>
    %46 = tpu.matmul %44, %45, %cst_30 {dimension_numbers = #tpu.dot_dimension_numbers<[1], [1], [0], [0], [0, 0, 1, 0], [], []>} : vector<8x8xbf16>, vector<8x8xbf16>, vector<8x8xf32> -> vector<8x8xf32>
    %47 = arith.addf %46, %6 : vector<8x8xf32>
    %c1 = arith.constant 1 : index
    %c0_31 = arith.constant 0 : index
    %c0_32 = arith.constant 0 : index
    %48 = vector.load %arg8[%c1, %c0_31, %c0_32] : memref<4x8x1xf32, #tpu.memory_space<vmem>>, vector<1x8x1xf32>
    %49 = vector.shape_cast %48 : vector<1x8x1xf32> to vector<8x1xf32>
    %cst_33 = arith.constant dense<0xFF800000> : vector<8xf32>
    %50 = vector.multi_reduction <maximumf>, %47, %cst_33 [1] : vector<8x8xf32> to vector<8xf32>
    %51 = vector.shape_cast %50 : vector<8xf32> to vector<8x1xf32>
    %52 = arith.maximumf %49, %51 : vector<8x1xf32>
    %53 = arith.subf %49, %52 : vector<8x1xf32>
    %54 = math.exp %53 : vector<8x1xf32>
    %55 = vector.broadcast %52 : vector<8x1xf32> to vector<8x8xf32>
    %56 = arith.subf %47, %55 : vector<8x8xf32>
    %57 = math.exp %56 : vector<8x8xf32>
    %c1_34 = arith.constant 1 : index
    %c0_35 = arith.constant 0 : index
    %c0_36 = arith.constant 0 : index
    %58 = vector.load %arg9[%c1_34, %c0_35, %c0_36] : memref<4x8x1xf32, #tpu.memory_space<vmem>>, vector<1x8x1xf32>
    %59 = vector.shape_cast %58 : vector<1x8x1xf32> to vector<8x1xf32>
    %60 = arith.mulf %54, %59 : vector<8x1xf32>
    %cst_37 = arith.constant dense<0.000000e+00> : vector<8xf32>
    %61 = vector.multi_reduction <add>, %57, %cst_37 [1] : vector<8x8xf32> to vector<8xf32>
    %62 = vector.shape_cast %61 : vector<8xf32> to vector<8x1xf32>
    %63 = arith.addf %60, %62 : vector<8x1xf32>
    %c1_38 = arith.constant 1 : index
    %c0_39 = arith.constant 0 : index
    %c0_40 = arith.constant 0 : index
    %64 = vector.load %arg9[%c1_38, %c0_39, %c0_40] : memref<4x8x1xf32, #tpu.memory_space<vmem>>, vector<1x8x1xf32>
    %65 = vector.shape_cast %64 : vector<1x8x1xf32> to vector<8x1xf32>
    %66 = vector.shape_cast %63 : vector<8x1xf32> to vector<1x8x1xf32>
    tpu.vector_store %arg9[%c1_38, %c0_39, %c0_40], %66 {strides = array<i32>} : memref<4x8x1xf32, #tpu.memory_space<vmem>>, vector<1x8x1xf32>,
    %c1_41 = arith.constant 1 : index
    %c0_42 = arith.constant 0 : index
    %c0_43 = arith.constant 0 : index
    %67 = vector.load %arg8[%c1_41, %c0_42, %c0_43] : memref<4x8x1xf32, #tpu.memory_space<vmem>>, vector<1x8x1xf32>
    %68 = vector.shape_cast %67 : vector<1x8x1xf32> to vector<8x1xf32>
    %69 = vector.shape_cast %52 : vector<8x1xf32> to vector<1x8x1xf32>
    tpu.vector_store %arg8[%c1_41, %c0_42, %c0_43], %69 {strides = array<i32>} : memref<4x8x1xf32, #tpu.memory_space<vmem>>, vector<1x8x1xf32>,
    %70 = arith.truncf %57 : vector<8x8xf32> to vector<8x8xbf16>
    %71 = vector.extract_strided_slice %12 {offsets = [0, 8], sizes = [8, 8], strides = [1, 1]} : vector<8x32xbf16> to vector<8x8xbf16>
    %cst_44 = arith.constant dense<0.000000e+00> : vector<8x8xf32>
    %72 = tpu.matmul %70, %71, %cst_44 {dimension_numbers = #tpu.dot_dimension_numbers<[1], [0], [0], [1], [0, 0, 1, 1], [], []>} : vector<8x8xbf16>, vector<8x8xbf16>, vector<8x8xf32> -> vector<8x8xf32>
    %73 = vector.shape_cast %54 : vector<8x1xf32> to vector<8x1xf32>
    %74 = vector.broadcast %73 : vector<8x1xf32> to vector<8x8xf32>
    %75 = vector.extract_strided_slice %8 {offsets = [0, 16], sizes = [8, 8], strides = [1, 1]} : vector<8x32xbf16> to vector<8x8xbf16>
    %76 = vector.extract_strided_slice %10 {offsets = [0, 16], sizes = [8, 8], strides = [1, 1]} : vector<8x32xbf16> to vector<8x8xbf16>
    %cst_45 = arith.constant dense<0.000000e+00> : vector<8x8xf32>
    %77 = tpu.matmul %75, %76, %cst_45 {dimension_numbers = #tpu.dot_dimension_numbers<[1], [1], [0], [0], [0, 0, 1, 0], [], []>} : vector<8x8xbf16>, vector<8x8xbf16>, vector<8x8xf32> -> vector<8x8xf32>
    %78 = arith.addf %77, %6 : vector<8x8xf32>
    %c2 = arith.constant 2 : index
    %c0_46 = arith.constant 0 : index
    %c0_47 = arith.constant 0 : index
    %79 = vector.load %arg8[%c2, %c0_46, %c0_47] : memref<4x8x1xf32, #tpu.memory_space<vmem>>, vector<1x8x1xf32>
    %80 = vector.shape_cast %79 : vector<1x8x1xf32> to vector<8x1xf32>
    %cst_48 = arith.constant dense<0xFF800000> : vector<8xf32>
    %81 = vector.multi_reduction <maximumf>, %78, %cst_48 [1] : vector<8x8xf32> to vector<8xf32>
    %82 = vector.shape_cast %81 : vector<8xf32> to vector<8x1xf32>
    %83 = arith.maximumf %80, %82 : vector<8x1xf32>
    %84 = arith.subf %80, %83 : vector<8x1xf32>
    %85 = math.exp %84 : vector<8x1xf32>
    %86 = vector.broadcast %83 : vector<8x1xf32> to vector<8x8xf32>
    %87 = arith.subf %78, %86 : vector<8x8xf32>
    %88 = math.exp %87 : vector<8x8xf32>
    %c2_49 = arith.constant 2 : index
    %c0_50 = arith.constant 0 : index
    %c0_51 = arith.constant 0 : index
    %89 = vector.load %arg9[%c2_49, %c0_50, %c0_51] : memref<4x8x1xf32, #tpu.memory_space<vmem>>, vector<1x8x1xf32>
    %90 = vector.shape_cast %89 : vector<1x8x1xf32> to vector<8x1xf32>
    %91 = arith.mulf %85, %90 : vector<8x1xf32>
    %cst_52 = arith.constant dense<0.000000e+00> : vector<8xf32>
    %92 = vector.multi_reduction <add>, %88, %cst_52 [1] : vector<8x8xf32> to vector<8xf32>
    %93 = vector.shape_cast %92 : vector<8xf32> to vector<8x1xf32>
    %94 = arith.addf %91, %93 : vector<8x1xf32>
    %c2_53 = arith.constant 2 : index
    %c0_54 = arith.constant 0 : index
    %c0_55 = arith.constant 0 : index
    %95 = vector.load %arg9[%c2_53, %c0_54, %c0_55] : memref<4x8x1xf32, #tpu.memory_space<vmem>>, vector<1x8x1xf32>
    %96 = vector.shape_cast %95 : vector<1x8x1xf32> to vector<8x1xf32>
    %97 = vector.shape_cast %94 : vector<8x1xf32> to vector<1x8x1xf32>
    tpu.vector_store %arg9[%c2_53, %c0_54, %c0_55], %97 {strides = array<i32>} : memref<4x8x1xf32, #tpu.memory_space<vmem>>, vector<1x8x1xf32>,
    %c2_56 = arith.constant 2 : index
    %c0_57 = arith.constant 0 : index
    %c0_58 = arith.constant 0 : index
    %98 = vector.load %arg8[%c2_56, %c0_57, %c0_58] : memref<4x8x1xf32, #tpu.memory_space<vmem>>, vector<1x8x1xf32>
    %99 = vector.shape_cast %98 : vector<1x8x1xf32> to vector<8x1xf32>
    %100 = vector.shape_cast %83 : vector<8x1xf32> to vector<1x8x1xf32>
    tpu.vector_store %arg8[%c2_56, %c0_57, %c0_58], %100 {strides = array<i32>} : memref<4x8x1xf32, #tpu.memory_space<vmem>>, vector<1x8x1xf32>,
    %101 = arith.truncf %88 : vector<8x8xf32> to vector<8x8xbf16>
    %102 = vector.extract_strided_slice %12 {offsets = [0, 16], sizes = [8, 8], strides = [1, 1]} : vector<8x32xbf16> to vector<8x8xbf16>
    %cst_59 = arith.constant dense<0.000000e+00> : vector<8x8xf32>
    %103 = tpu.matmul %101, %102, %cst_59 {dimension_numbers = #tpu.dot_dimension_numbers<[1], [0], [0], [1], [0, 0, 1, 1], [], []>} : vector<8x8xbf16>, vector<8x8xbf16>, vector<8x8xf32> -> vector<8x8xf32>
    %104 = vector.shape_cast %85 : vector<8x1xf32> to vector<8x1xf32>
    %105 = vector.broadcast %104 : vector<8x1xf32> to vector<8x8xf32>
    %106 = vector.extract_strided_slice %8 {offsets = [0, 24], sizes = [8, 8], strides = [1, 1]} : vector<8x32xbf16> to vector<8x8xbf16>
    %107 = vector.extract_strided_slice %10 {offsets = [0, 24], sizes = [8, 8], strides = [1, 1]} : vector<8x32xbf16> to vector<8x8xbf16>
    %cst_60 = arith.constant dense<0.000000e+00> : vector<8x8xf32>
    %108 = tpu.matmul %106, %107, %cst_60 {dimension_numbers = #tpu.dot_dimension_numbers<[1], [1], [0], [0], [0, 0, 1, 0], [], []>} : vector<8x8xbf16>, vector<8x8xbf16>, vector<8x8xf32> -> vector<8x8xf32>
    %109 = arith.addf %108, %6 : vector<8x8xf32>
    %c3 = arith.constant 3 : index
    %c0_61 = arith.constant 0 : index
    %c0_62 = arith.constant 0 : index
    %110 = vector.load %arg8[%c3, %c0_61, %c0_62] : memref<4x8x1xf32, #tpu.memory_space<vmem>>, vector<1x8x1xf32>
    %111 = vector.shape_cast %110 : vector<1x8x1xf32> to vector<8x1xf32>
    %cst_63 = arith.constant dense<0xFF800000> : vector<8xf32>
    %112 = vector.multi_reduction <maximumf>, %109, %cst_63 [1] : vector<8x8xf32> to vector<8xf32>
    %113 = vector.shape_cast %112 : vector<8xf32> to vector<8x1xf32>
    %114 = arith.maximumf %111, %113 : vector<8x1xf32>
    %115 = arith.subf %111, %114 : vector<8x1xf32>
    %116 = math.exp %115 : vector<8x1xf32>
    %117 = vector.broadcast %114 : vector<8x1xf32> to vector<8x8xf32>
    %118 = arith.subf %109, %117 : vector<8x8xf32>
    %119 = math.exp %118 : vector<8x8xf32>
    %c3_64 = arith.constant 3 : index
    %c0_65 = arith.constant 0 : index
    %c0_66 = arith.constant 0 : index
    %120 = vector.load %arg9[%c3_64, %c0_65, %c0_66] : memref<4x8x1xf32, #tpu.memory_space<vmem>>, vector<1x8x1xf32>
    %121 = vector.shape_cast %120 : vector<1x8x1xf32> to vector<8x1xf32>
    %122 = arith.mulf %116, %121 : vector<8x1xf32>
    %cst_67 = arith.constant dense<0.000000e+00> : vector<8xf32>
    %123 = vector.multi_reduction <add>, %119, %cst_67 [1] : vector<8x8xf32> to vector<8xf32>
    %124 = vector.shape_cast %123 : vector<8xf32> to vector<8x1xf32>
    %125 = arith.addf %122, %124 : vector<8x1xf32>
    %c3_68 = arith.constant 3 : index
    %c0_69 = arith.constant 0 : index
    %c0_70 = arith.constant 0 : index
    %126 = vector.load %arg9[%c3_68, %c0_69, %c0_70] : memref<4x8x1xf32, #tpu.memory_space<vmem>>, vector<1x8x1xf32>
    %127 = vector.shape_cast %126 : vector<1x8x1xf32> to vector<8x1xf32>
    %128 = vector.shape_cast %125 : vector<8x1xf32> to vector<1x8x1xf32>
    tpu.vector_store %arg9[%c3_68, %c0_69, %c0_70], %128 {strides = array<i32>} : memref<4x8x1xf32, #tpu.memory_space<vmem>>, vector<1x8x1xf32>,
    %c3_71 = arith.constant 3 : index
    %c0_72 = arith.constant 0 : index
    %c0_73 = arith.constant 0 : index
    %129 = vector.load %arg8[%c3_71, %c0_72, %c0_73] : memref<4x8x1xf32, #tpu.memory_space<vmem>>, vector<1x8x1xf32>
    %130 = vector.shape_cast %129 : vector<1x8x1xf32> to vector<8x1xf32>
    %131 = vector.shape_cast %114 : vector<8x1xf32> to vector<1x8x1xf32>
    tpu.vector_store %arg8[%c3_71, %c0_72, %c0_73], %131 {strides = array<i32>} : memref<4x8x1xf32, #tpu.memory_space<vmem>>, vector<1x8x1xf32>,
    %132 = arith.truncf %119 : vector<8x8xf32> to vector<8x8xbf16>
    %133 = vector.extract_strided_slice %12 {offsets = [0, 24], sizes = [8, 8], strides = [1, 1]} : vector<8x32xbf16> to vector<8x8xbf16>
    %cst_74 = arith.constant dense<0.000000e+00> : vector<8x8xf32>
    %134 = tpu.matmul %132, %133, %cst_74 {dimension_numbers = #tpu.dot_dimension_numbers<[1], [0], [0], [1], [0, 0, 1, 1], [], []>} : vector<8x8xbf16>, vector<8x8xbf16>, vector<8x8xf32> -> vector<8x8xf32>
    %135 = vector.shape_cast %116 : vector<8x1xf32> to vector<8x1xf32>
    %136 = vector.broadcast %135 : vector<8x1xf32> to vector<8x8xf32>
    %137 = tpu.concatenate %41, %72, %103, %134 in 1 : vector<8x8xf32>, vector<8x8xf32>, vector<8x8xf32>, vector<8x8xf32> -> vector<8x32xf32>
    %138 = tpu.concatenate %43, %74, %105, %136 in 1 : vector<8x8xf32>, vector<8x8xf32>, vector<8x8xf32>, vector<8x8xf32> -> vector<8x32xf32>
    %c0_75 = arith.constant 0 : index
    %c0_76 = arith.constant 0 : index
    %139 = vector.load %arg10[%c0_75, %c0_76] : memref<8x32xf32, #tpu.memory_space<vmem>>, vector<8x32xf32>
    %140 = arith.mulf %138, %139 : vector<8x32xf32>
    %141 = arith.addf %140, %137 : vector<8x32xf32>
    %c0_77 = arith.constant 0 : index
    %c0_78 = arith.constant 0 : index
    %142 = vector.load %arg10[%c0_77, %c0_78] : memref<8x32xf32, #tpu.memory_space<vmem>>, vector<8x32xf32>
    tpu.vector_store %arg10[%c0_77, %c0_78], %141 {strides = array<i32>} : memref<8x32xf32, #tpu.memory_space<vmem>>, vector<8x32xf32>,
    %c0_i32_79 = arith.constant 0 : i32
    %143 = arith.cmpi eq, %arg2, %c0_i32_79 : i32
    %144 = arith.extui %143 : i1 to i32
    %c0_i32_80 = arith.constant 0 : i32
    %145 = arith.cmpi ne, %144, %c0_i32_80 : i32
    scf.if %145 {
      %c0_81 = arith.constant 0 : index
      %c0_82 = arith.constant 0 : index
      %c0_83 = arith.constant 0 : index
      %146 = vector.load %arg9[%c0_81, %c0_82, %c0_83] : memref<4x8x1xf32, #tpu.memory_space<vmem>>, vector<1x8x1xf32>
      %147 = vector.shape_cast %146 : vector<1x8x1xf32> to vector<8x1xf32>
      %148 = tpu.reciprocal %147 {approx = true} : vector<8x1xf32> -> vector<8x1xf32>
      %149 = vector.shape_cast %148 : vector<8x1xf32> to vector<8x1xf32>
      %150 = vector.broadcast %149 : vector<8x1xf32> to vector<8x8xf32>
      %c1_84 = arith.constant 1 : index
      %c0_85 = arith.constant 0 : index
      %c0_86 = arith.constant 0 : index
      %151 = vector.load %arg9[%c1_84, %c0_85, %c0_86] : memref<4x8x1xf32, #tpu.memory_space<vmem>>, vector<1x8x1xf32>
      %152 = vector.shape_cast %151 : vector<1x8x1xf32> to vector<8x1xf32>
      %153 = tpu.reciprocal %152 {approx = true} : vector<8x1xf32> -> vector<8x1xf32>
      %154 = vector.shape_cast %153 : vector<8x1xf32> to vector<8x1xf32>
      %155 = vector.broadcast %154 : vector<8x1xf32> to vector<8x8xf32>
      %c2_87 = arith.constant 2 : index
      %c0_88 = arith.constant 0 : index
      %c0_89 = arith.constant 0 : index
      %156 = vector.load %arg9[%c2_87, %c0_88, %c0_89] : memref<4x8x1xf32, #tpu.memory_space<vmem>>, vector<1x8x1xf32>
      %157 = vector.shape_cast %156 : vector<1x8x1xf32> to vector<8x1xf32>
      %158 = tpu.reciprocal %157 {approx = true} : vector<8x1xf32> -> vector<8x1xf32>
      %159 = vector.shape_cast %158 : vector<8x1xf32> to vector<8x1xf32>
      %160 = vector.broadcast %159 : vector<8x1xf32> to vector<8x8xf32>
      %c3_90 = arith.constant 3 : index
      %c0_91 = arith.constant 0 : index
      %c0_92 = arith.constant 0 : index
      %161 = vector.load %arg9[%c3_90, %c0_91, %c0_92] : memref<4x8x1xf32, #tpu.memory_space<vmem>>, vector<1x8x1xf32>
      %162 = vector.shape_cast %161 : vector<1x8x1xf32> to vector<8x1xf32>
      %163 = tpu.reciprocal %162 {approx = true} : vector<8x1xf32> -> vector<8x1xf32>
      %164 = vector.shape_cast %163 : vector<8x1xf32> to vector<8x1xf32>
      %165 = vector.broadcast %164 : vector<8x1xf32> to vector<8x8xf32>
      %166 = tpu.concatenate %150, %155, %160, %165 in 1 : vector<8x8xf32>, vector<8x8xf32>, vector<8x8xf32>, vector<8x8xf32> -> vector<8x32xf32>
      %c0_93 = arith.constant 0 : index
      %c0_94 = arith.constant 0 : index
      %167 = vector.load %arg10[%c0_93, %c0_94] : memref<8x32xf32, #tpu.memory_space<vmem>>, vector<8x32xf32>
      %168 = arith.mulf %167, %166 : vector<8x32xf32>
      %169 = arith.truncf %168 : vector<8x32xf32> to vector<8x32xbf16>
      %c0_95 = arith.constant 0 : index
      %c0_96 = arith.constant 0 : index
      %c0_97 = arith.constant 0 : index
      %170 = vector.load %arg7[%c0_95, %c0_96, %c0_97] : memref<1x8x32xbf16, #tpu.memory_space<vmem>>, vector<1x8x32xbf16>
      %171 = vector.shape_cast %170 : vector<1x8x32xbf16> to vector<8x32xbf16>
      %172 = vector.shape_cast %169 : vector<8x32xbf16> to vector<1x8x32xbf16>
      tpu.vector_store %arg7[%c0_95, %c0_96, %c0_97], %172 {strides = array<i32>} : memref<1x8x32xbf16, #tpu.memory_space<vmem>>, vector<1x8x32xbf16>,
    } else {
    }
    return
  }
  func.func @transform_0(%arg0: i32, %arg1: i32, %arg2: i32) -> (i32, i32, i32, i32) {
    %c0_i32 = arith.constant 0 : i32
    %c0_i32_0 = arith.constant 0 : i32
    %c0_i32_1 = arith.constant 0 : i32
    return %c0_i32, %arg0, %arg1, %c0_i32_0 : i32, i32, i32, i32
  }
  func.func @transform_1(%arg0: i32, %arg1: i32, %arg2: i32) -> (i32, i32, i32, i32) {
    %c1_i32 = arith.constant 1 : i32
    %c0_i32 = arith.constant 0 : i32
    %c0_i32_0 = arith.constant 0 : i32
    return %c1_i32, %arg0, %arg2, %c0_i32 : i32, i32, i32, i32
  }
  func.func @transform_2(%arg0: i32, %arg1: i32, %arg2: i32) -> (i32, i32, i32, i32) {
    %c2_i32 = arith.constant 2 : i32
    %c0_i32 = arith.constant 0 : i32
    %c0_i32_0 = arith.constant 0 : i32
    return %c2_i32, %arg0, %arg2, %c0_i32 : i32, i32, i32, i32
  }
  func.func @transform_3(%arg0: i32, %arg1: i32, %arg2: i32) -> (i32, i32, i32) {
    %c0_i32 = arith.constant 0 : i32
    %c0_i32_0 = arith.constant 0 : i32
    return %arg0, %c0_i32, %arg2 : i32, i32, i32
  }
  func.func @transform_4(%arg0: i32, %arg1: i32, %arg2: i32) -> (i32, i32, i32) {
    %c0_i32 = arith.constant 0 : i32
    %c0_i32_0 = arith.constant 0 : i32
    return %arg0, %arg1, %c0_i32 : i32, i32, i32
  }
}

module attributes {stable_mosaic.version = 11 : i64} {
  func.func @_dense_kernel(%arg0: i32, %arg1: i32, %arg2: i32, %arg3: memref<16x32xbf16, #tpu.memory_space<vmem>>, %arg4: memref<32x64xbf16, #tpu.memory_space<vmem>>, %arg5: memref<1x64xf32, #tpu.memory_space<vmem>>, %arg6: memref<16x64xbf16, #tpu.memory_space<vmem>>, %arg7: memref<16x64xf32, #tpu.memory_space<vmem>>) attributes {dimension_semantics = [#tpu.dimension_semantics<parallel>, #tpu.dimension_semantics<parallel>, #tpu.dimension_semantics<arbitrary>], iteration_bounds = array<i64: 1, 1, 1>, scalar_prefetch = 0 : i64, scratch_operands = 1 : i64, tpu.core_type = #tpu.core_type<tc>, window_params = [{transform_indices = @transform_0, window_bounds = array<i64: 16, 32>}, {transform_indices = @transform_1, window_bounds = array<i64: 32, 64>}, {transform_indices = @transform_2, window_bounds = array<i64: 1, 64>}, {transform_indices = @transform_3, window_bounds = array<i64: 16, 64>}]} {
    %c0_i32 = arith.constant 0 : i32
    %0 = arith.cmpi eq, %arg2, %c0_i32 : i32
    %1 = arith.extui %0 : i1 to i32
    %c0_i32_0 = arith.constant 0 : i32
    %2 = arith.cmpi ne, %1, %c0_i32_0 : i32
    scf.if %2 {
      %cst_10 = arith.constant 0.000000e+00 : f32
      %12 = vector.broadcast %cst_10 : f32 to vector<16x64xf32>
      %c0_11 = arith.constant 0 : index
      %c0_12 = arith.constant 0 : index
      %13 = vector.load %arg7[%c0_11, %c0_12] : memref<16x64xf32, #tpu.memory_space<vmem>>, vector<16x64xf32>
      tpu.vector_store %arg7[%c0_11, %c0_12], %12 {strides = array<i32>} : memref<16x64xf32, #tpu.memory_space<vmem>>, vector<16x64xf32>,
    } else {
    }
    %c0 = arith.constant 0 : index
    %c0_1 = arith.constant 0 : index
    %3 = vector.load %arg7[%c0, %c0_1] : memref<16x64xf32, #tpu.memory_space<vmem>>, vector<16x64xf32>
    %c0_2 = arith.constant 0 : index
    %c0_3 = arith.constant 0 : index
    %4 = vector.load %arg3[%c0_2, %c0_3] : memref<16x32xbf16, #tpu.memory_space<vmem>>, vector<16x32xbf16>
    %c0_4 = arith.constant 0 : index
    %c0_5 = arith.constant 0 : index
    %5 = vector.load %arg4[%c0_4, %c0_5] : memref<32x64xbf16, #tpu.memory_space<vmem>>, vector<32x64xbf16>
    %cst = arith.constant dense<0.000000e+00> : vector<16x64xf32>
    %6 = tpu.matmul %4, %5, %cst {dimension_numbers = #tpu.dot_dimension_numbers<[1], [0], [0], [1], [0, 0, 1, 1], [], []>} : vector<16x32xbf16>, vector<32x64xbf16>, vector<16x64xf32> -> vector<16x64xf32>
    %7 = arith.addf %3, %6 : vector<16x64xf32>
    %c0_6 = arith.constant 0 : index
    %c0_7 = arith.constant 0 : index
    %8 = vector.load %arg7[%c0_6, %c0_7] : memref<16x64xf32, #tpu.memory_space<vmem>>, vector<16x64xf32>
    tpu.vector_store %arg7[%c0_6, %c0_7], %7 {strides = array<i32>} : memref<16x64xf32, #tpu.memory_space<vmem>>, vector<16x64xf32>,
    %c0_i32_8 = arith.constant 0 : i32
    %9 = arith.cmpi eq, %arg2, %c0_i32_8 : i32
    %10 = arith.extui %9 : i1 to i32
    %c0_i32_9 = arith.constant 0 : i32
    %11 = arith.cmpi ne, %10, %c0_i32_9 : i32
    scf.if %11 {
      %c0_10 = arith.constant 0 : index
      %c0_11 = arith.constant 0 : index
      %12 = vector.load %arg7[%c0_10, %c0_11] : memref<16x64xf32, #tpu.memory_space<vmem>>, vector<16x64xf32>
      %c0_12 = arith.constant 0 : index
      %c0_13 = arith.constant 0 : index
      %13 = vector.load %arg5[%c0_12, %c0_13] : memref<1x64xf32, #tpu.memory_space<vmem>>, vector<1x64xf32>
      %14 = vector.broadcast %13 : vector<1x64xf32> to vector<16x64xf32>
      %15 = arith.addf %12, %14 : vector<16x64xf32>
      %16 = arith.mulf %15, %15 : vector<16x64xf32>
      %17 = arith.mulf %15, %16 : vector<16x64xf32>
      %cst_14 = arith.constant 4.471500e-02 : f32
      %18 = vector.broadcast %cst_14 : f32 to vector<16x64xf32>
      %19 = arith.mulf %18, %17 : vector<16x64xf32>
      %20 = arith.addf %15, %19 : vector<16x64xf32>
      %cst_15 = arith.constant 0.797884583 : f32
      %21 = vector.broadcast %cst_15 : f32 to vector<16x64xf32>
      %22 = arith.mulf %21, %20 : vector<16x64xf32>
      %23 = math.tanh %22 : vector<16x64xf32>
      %cst_16 = arith.constant 1.000000e+00 : f32
      %24 = vector.broadcast %cst_16 : f32 to vector<16x64xf32>
      %25 = arith.addf %24, %23 : vector<16x64xf32>
      %cst_17 = arith.constant 5.000000e-01 : f32
      %26 = vector.broadcast %cst_17 : f32 to vector<16x64xf32>
      %27 = arith.mulf %26, %25 : vector<16x64xf32>
      %28 = arith.mulf %15, %27 : vector<16x64xf32>
      %29 = arith.truncf %28 : vector<16x64xf32> to vector<16x64xbf16>
      %c0_18 = arith.constant 0 : index
      %c0_19 = arith.constant 0 : index
      %30 = vector.load %arg6[%c0_18, %c0_19] : memref<16x64xbf16, #tpu.memory_space<vmem>>, vector<16x64xbf16>
      tpu.vector_store %arg6[%c0_18, %c0_19], %29 {strides = array<i32>} : memref<16x64xbf16, #tpu.memory_space<vmem>>, vector<16x64xbf16>,
    } else {
    }
    return
  }
  func.func @transform_0(%arg0: i32, %arg1: i32, %arg2: i32) -> (i32, i32) {
    %c0_i32 = arith.constant 0 : i32
    return %arg0, %arg2 : i32, i32
  }
  func.func @transform_1(%arg0: i32, %arg1: i32, %arg2: i32) -> (i32, i32) {
    %c0_i32 = arith.constant 0 : i32
    return %arg2, %arg1 : i32, i32
  }
  func.func @transform_2(%arg0: i32, %arg1: i32, %arg2: i32) -> (i32, i32) {
    %c0_i32 = arith.constant 0 : i32
    %c0_i32_0 = arith.constant 0 : i32
    return %c0_i32, %arg1 : i32, i32
  }
  func.func @transform_3(%arg0: i32, %arg1: i32, %arg2: i32) -> (i32, i32) {
    %c0_i32 = arith.constant 0 : i32
    return %arg0, %arg1 : i32, i32
  }
}

module attributes {stable_mosaic.version = 11 : i64} {
  func.func @_dense_res_ln_kernel(%arg0: i32, %arg1: i32, %arg2: memref<16x64xbf16, #tpu.memory_space<vmem>>, %arg3: memref<64x32xbf16, #tpu.memory_space<vmem>>, %arg4: memref<1x32xf32, #tpu.memory_space<vmem>>, %arg5: memref<16x32xbf16, #tpu.memory_space<vmem>>, %arg6: memref<1x32xf32, #tpu.memory_space<vmem>>, %arg7: memref<1x32xf32, #tpu.memory_space<vmem>>, %arg8: memref<16x32xf32, #tpu.memory_space<vmem>>, %arg9: memref<16x32xf32, #tpu.memory_space<vmem>>) attributes {dimension_semantics = [#tpu.dimension_semantics<parallel>, #tpu.dimension_semantics<arbitrary>], iteration_bounds = array<i64: 1, 1>, scalar_prefetch = 0 : i64, scratch_operands = 1 : i64, tpu.core_type = #tpu.core_type<tc>, window_params = [{transform_indices = @transform_0, window_bounds = array<i64: 16, 64>}, {transform_indices = @transform_1, window_bounds = array<i64: 64, 32>}, {pipeline_mode = #tpu.pipeline_mode<synchronous>, transform_indices = @transform_2, window_bounds = array<i64: 1, 32>}, {transform_indices = @transform_3, window_bounds = array<i64: 16, 32>}, {pipeline_mode = #tpu.pipeline_mode<synchronous>, transform_indices = @transform_4, window_bounds = array<i64: 1, 32>}, {pipeline_mode = #tpu.pipeline_mode<synchronous>, transform_indices = @transform_5, window_bounds = array<i64: 1, 32>}, {transform_indices = @transform_6, window_bounds = array<i64: 16, 32>}]} {
    %c0_i32 = arith.constant 0 : i32
    %0 = arith.cmpi eq, %arg1, %c0_i32 : i32
    %1 = arith.extui %0 : i1 to i32
    %c0_i32_0 = arith.constant 0 : i32
    %2 = arith.cmpi ne, %1, %c0_i32_0 : i32
    scf.if %2 {
      %cst_10 = arith.constant 0.000000e+00 : f32
      %12 = vector.broadcast %cst_10 : f32 to vector<16x32xf32>
      %c0_11 = arith.constant 0 : index
      %c0_12 = arith.constant 0 : index
      %13 = vector.load %arg9[%c0_11, %c0_12] : memref<16x32xf32, #tpu.memory_space<vmem>>, vector<16x32xf32>
      tpu.vector_store %arg9[%c0_11, %c0_12], %12 {strides = array<i32>} : memref<16x32xf32, #tpu.memory_space<vmem>>, vector<16x32xf32>,
    } else {
    }
    %c0 = arith.constant 0 : index
    %c0_1 = arith.constant 0 : index
    %3 = vector.load %arg9[%c0, %c0_1] : memref<16x32xf32, #tpu.memory_space<vmem>>, vector<16x32xf32>
    %c0_2 = arith.constant 0 : index
    %c0_3 = arith.constant 0 : index
    %4 = vector.load %arg2[%c0_2, %c0_3] : memref<16x64xbf16, #tpu.memory_space<vmem>>, vector<16x64xbf16>
    %c0_4 = arith.constant 0 : index
    %c0_5 = arith.constant 0 : index
    %5 = vector.load %arg3[%c0_4, %c0_5] : memref<64x32xbf16, #tpu.memory_space<vmem>>, vector<64x32xbf16>
    %cst = arith.constant dense<0.000000e+00> : vector<16x32xf32>
    %6 = tpu.matmul %4, %5, %cst {dimension_numbers = #tpu.dot_dimension_numbers<[1], [0], [0], [1], [0, 0, 1, 1], [], []>} : vector<16x64xbf16>, vector<64x32xbf16>, vector<16x32xf32> -> vector<16x32xf32>
    %7 = arith.addf %3, %6 : vector<16x32xf32>
    %c0_6 = arith.constant 0 : index
    %c0_7 = arith.constant 0 : index
    %8 = vector.load %arg9[%c0_6, %c0_7] : memref<16x32xf32, #tpu.memory_space<vmem>>, vector<16x32xf32>
    tpu.vector_store %arg9[%c0_6, %c0_7], %7 {strides = array<i32>} : memref<16x32xf32, #tpu.memory_space<vmem>>, vector<16x32xf32>,
    %c0_i32_8 = arith.constant 0 : i32
    %9 = arith.cmpi eq, %arg1, %c0_i32_8 : i32
    %10 = arith.extui %9 : i1 to i32
    %c0_i32_9 = arith.constant 0 : i32
    %11 = arith.cmpi ne, %10, %c0_i32_9 : i32
    scf.if %11 {
      %c0_10 = arith.constant 0 : index
      %c0_11 = arith.constant 0 : index
      %12 = vector.load %arg9[%c0_10, %c0_11] : memref<16x32xf32, #tpu.memory_space<vmem>>, vector<16x32xf32>
      %c0_12 = arith.constant 0 : index
      %c0_13 = arith.constant 0 : index
      %13 = vector.load %arg4[%c0_12, %c0_13] : memref<1x32xf32, #tpu.memory_space<vmem>>, vector<1x32xf32>
      %14 = vector.broadcast %13 : vector<1x32xf32> to vector<16x32xf32>
      %15 = arith.addf %12, %14 : vector<16x32xf32>
      %c0_14 = arith.constant 0 : index
      %c0_15 = arith.constant 0 : index
      %16 = vector.load %arg5[%c0_14, %c0_15] : memref<16x32xbf16, #tpu.memory_space<vmem>>, vector<16x32xbf16>
      %17 = arith.extf %16 : vector<16x32xbf16> to vector<16x32xf32>
      %18 = arith.addf %15, %17 : vector<16x32xf32>
      %cst_16 = arith.constant dense<0.000000e+00> : vector<16xf32>
      %19 = vector.multi_reduction <add>, %18, %cst_16 [1] : vector<16x32xf32> to vector<16xf32>
      %20 = vector.shape_cast %19 : vector<16xf32> to vector<16x1xf32>
      %cst_17 = arith.constant 3.200000e+01 : f32
      %21 = vector.broadcast %cst_17 : f32 to vector<16x1xf32>
      %22 = arith.divf %20, %21 : vector<16x1xf32>
      %23 = vector.broadcast %22 : vector<16x1xf32> to vector<16x32xf32>
      %24 = arith.subf %18, %23 : vector<16x32xf32>
      %25 = arith.mulf %24, %24 : vector<16x32xf32>
      %cst_18 = arith.constant dense<0.000000e+00> : vector<16xf32>
      %26 = vector.multi_reduction <add>, %25, %cst_18 [1] : vector<16x32xf32> to vector<16xf32>
      %27 = vector.shape_cast %26 : vector<16xf32> to vector<16x1xf32>
      %cst_19 = arith.constant 3.200000e+01 : f32
      %28 = vector.broadcast %cst_19 : f32 to vector<16x1xf32>
      %29 = arith.divf %27, %28 : vector<16x1xf32>
      %cst_20 = arith.constant 9.99999996E-13 : f32
      %30 = vector.broadcast %cst_20 : f32 to vector<16x1xf32>
      %31 = arith.addf %29, %30 : vector<16x1xf32>
      %32 = math.rsqrt %31 : vector<16x1xf32>
      %33 = vector.broadcast %22 : vector<16x1xf32> to vector<16x32xf32>
      %34 = arith.subf %18, %33 : vector<16x32xf32>
      %35 = vector.broadcast %32 : vector<16x1xf32> to vector<16x32xf32>
      %36 = arith.mulf %34, %35 : vector<16x32xf32>
      %c0_21 = arith.constant 0 : index
      %c0_22 = arith.constant 0 : index
      %37 = vector.load %arg6[%c0_21, %c0_22] : memref<1x32xf32, #tpu.memory_space<vmem>>, vector<1x32xf32>
      %38 = vector.broadcast %37 : vector<1x32xf32> to vector<16x32xf32>
      %39 = arith.mulf %36, %38 : vector<16x32xf32>
      %c0_23 = arith.constant 0 : index
      %c0_24 = arith.constant 0 : index
      %40 = vector.load %arg7[%c0_23, %c0_24] : memref<1x32xf32, #tpu.memory_space<vmem>>, vector<1x32xf32>
      %41 = vector.broadcast %40 : vector<1x32xf32> to vector<16x32xf32>
      %42 = arith.addf %39, %41 : vector<16x32xf32>
      %c0_25 = arith.constant 0 : index
      %c0_26 = arith.constant 0 : index
      %43 = vector.load %arg8[%c0_25, %c0_26] : memref<16x32xf32, #tpu.memory_space<vmem>>, vector<16x32xf32>
      tpu.vector_store %arg8[%c0_25, %c0_26], %42 {strides = array<i32>} : memref<16x32xf32, #tpu.memory_space<vmem>>, vector<16x32xf32>,
    } else {
    }
    return
  }
  func.func @transform_0(%arg0: i32, %arg1: i32) -> (i32, i32) {
    %c0_i32 = arith.constant 0 : i32
    return %arg0, %arg1 : i32, i32
  }
  func.func @transform_1(%arg0: i32, %arg1: i32) -> (i32, i32) {
    %c0_i32 = arith.constant 0 : i32
    %c0_i32_0 = arith.constant 0 : i32
    return %arg1, %c0_i32 : i32, i32
  }
  func.func @transform_2(%arg0: i32, %arg1: i32) -> (i32, i32) {
    %c0_i32 = arith.constant 0 : i32
    %c0_i32_0 = arith.constant 0 : i32
    %c0_i32_1 = arith.constant 0 : i32
    return %c0_i32, %c0_i32_0 : i32, i32
  }
  func.func @transform_3(%arg0: i32, %arg1: i32) -> (i32, i32) {
    %c0_i32 = arith.constant 0 : i32
    %c0_i32_0 = arith.constant 0 : i32
    return %arg0, %c0_i32 : i32, i32
  }
  func.func @transform_4(%arg0: i32, %arg1: i32) -> (i32, i32) {
    %c0_i32 = arith.constant 0 : i32
    %c0_i32_0 = arith.constant 0 : i32
    %c0_i32_1 = arith.constant 0 : i32
    return %c0_i32, %c0_i32_0 : i32, i32
  }
  func.func @transform_5(%arg0: i32, %arg1: i32) -> (i32, i32) {
    %c0_i32 = arith.constant 0 : i32
    %c0_i32_0 = arith.constant 0 : i32
    %c0_i32_1 = arith.constant 0 : i32
    return %c0_i32, %c0_i32_0 : i32, i32
  }
  func.func @transform_6(%arg0: i32, %arg1: i32) -> (i32, i32) {
    %c0_i32 = arith.constant 0 : i32
    %c0_i32_0 = arith.constant 0 : i32
    return %arg0, %c0_i32 : i32, i32
  }
}

module attributes {stable_mosaic.version = 11 : i64} {
  func.func @_dense_res_ln_kernel(%arg0: i32, %arg1: i32, %arg2: memref<16x64xbf16, #tpu.memory_space<vmem>>, %arg3: memref<64x32xbf16, #tpu.memory_space<vmem>>, %arg4: memref<1x32xf32, #tpu.memory_space<vmem>>, %arg5: memref<16x32xbf16, #tpu.memory_space<vmem>>, %arg6: memref<1x32xf32, #tpu.memory_space<vmem>>, %arg7: memref<1x32xf32, #tpu.memory_space<vmem>>, %arg8: memref<16x32xbf16, #tpu.memory_space<vmem>>, %arg9: memref<16x32xf32, #tpu.memory_space<vmem>>) attributes {dimension_semantics = [#tpu.dimension_semantics<parallel>, #tpu.dimension_semantics<arbitrary>], iteration_bounds = array<i64: 1, 1>, scalar_prefetch = 0 : i64, scratch_operands = 1 : i64, tpu.core_type = #tpu.core_type<tc>, window_params = [{transform_indices = @transform_0, window_bounds = array<i64: 16, 64>}, {transform_indices = @transform_1, window_bounds = array<i64: 64, 32>}, {pipeline_mode = #tpu.pipeline_mode<synchronous>, transform_indices = @transform_2, window_bounds = array<i64: 1, 32>}, {transform_indices = @transform_3, window_bounds = array<i64: 16, 32>}, {pipeline_mode = #tpu.pipeline_mode<synchronous>, transform_indices = @transform_4, window_bounds = array<i64: 1, 32>}, {pipeline_mode = #tpu.pipeline_mode<synchronous>, transform_indices = @transform_5, window_bounds = array<i64: 1, 32>}, {transform_indices = @transform_6, window_bounds = array<i64: 16, 32>}]} {
    %c0_i32 = arith.constant 0 : i32
    %0 = arith.cmpi eq, %arg1, %c0_i32 : i32
    %1 = arith.extui %0 : i1 to i32
    %c0_i32_0 = arith.constant 0 : i32
    %2 = arith.cmpi ne, %1, %c0_i32_0 : i32
    scf.if %2 {
      %cst_10 = arith.constant 0.000000e+00 : f32
      %12 = vector.broadcast %cst_10 : f32 to vector<16x32xf32>
      %c0_11 = arith.constant 0 : index
      %c0_12 = arith.constant 0 : index
      %13 = vector.load %arg9[%c0_11, %c0_12] : memref<16x32xf32, #tpu.memory_space<vmem>>, vector<16x32xf32>
      tpu.vector_store %arg9[%c0_11, %c0_12], %12 {strides = array<i32>} : memref<16x32xf32, #tpu.memory_space<vmem>>, vector<16x32xf32>,
    } else {
    }
    %c0 = arith.constant 0 : index
    %c0_1 = arith.constant 0 : index
    %3 = vector.load %arg9[%c0, %c0_1] : memref<16x32xf32, #tpu.memory_space<vmem>>, vector<16x32xf32>
    %c0_2 = arith.constant 0 : index
    %c0_3 = arith.constant 0 : index
    %4 = vector.load %arg2[%c0_2, %c0_3] : memref<16x64xbf16, #tpu.memory_space<vmem>>, vector<16x64xbf16>
    %c0_4 = arith.constant 0 : index
    %c0_5 = arith.constant 0 : index
    %5 = vector.load %arg3[%c0_4, %c0_5] : memref<64x32xbf16, #tpu.memory_space<vmem>>, vector<64x32xbf16>
    %cst = arith.constant dense<0.000000e+00> : vector<16x32xf32>
    %6 = tpu.matmul %4, %5, %cst {dimension_numbers = #tpu.dot_dimension_numbers<[1], [0], [0], [1], [0, 0, 1, 1], [], []>} : vector<16x64xbf16>, vector<64x32xbf16>, vector<16x32xf32> -> vector<16x32xf32>
    %7 = arith.addf %3, %6 : vector<16x32xf32>
    %c0_6 = arith.constant 0 : index
    %c0_7 = arith.constant 0 : index
    %8 = vector.load %arg9[%c0_6, %c0_7] : memref<16x32xf32, #tpu.memory_space<vmem>>, vector<16x32xf32>
    tpu.vector_store %arg9[%c0_6, %c0_7], %7 {strides = array<i32>} : memref<16x32xf32, #tpu.memory_space<vmem>>, vector<16x32xf32>,
    %c0_i32_8 = arith.constant 0 : i32
    %9 = arith.cmpi eq, %arg1, %c0_i32_8 : i32
    %10 = arith.extui %9 : i1 to i32
    %c0_i32_9 = arith.constant 0 : i32
    %11 = arith.cmpi ne, %10, %c0_i32_9 : i32
    scf.if %11 {
      %c0_10 = arith.constant 0 : index
      %c0_11 = arith.constant 0 : index
      %12 = vector.load %arg9[%c0_10, %c0_11] : memref<16x32xf32, #tpu.memory_space<vmem>>, vector<16x32xf32>
      %c0_12 = arith.constant 0 : index
      %c0_13 = arith.constant 0 : index
      %13 = vector.load %arg4[%c0_12, %c0_13] : memref<1x32xf32, #tpu.memory_space<vmem>>, vector<1x32xf32>
      %14 = vector.broadcast %13 : vector<1x32xf32> to vector<16x32xf32>
      %15 = arith.addf %12, %14 : vector<16x32xf32>
      %c0_14 = arith.constant 0 : index
      %c0_15 = arith.constant 0 : index
      %16 = vector.load %arg5[%c0_14, %c0_15] : memref<16x32xbf16, #tpu.memory_space<vmem>>, vector<16x32xbf16>
      %17 = arith.extf %16 : vector<16x32xbf16> to vector<16x32xf32>
      %18 = arith.addf %15, %17 : vector<16x32xf32>
      %cst_16 = arith.constant dense<0.000000e+00> : vector<16xf32>
      %19 = vector.multi_reduction <add>, %18, %cst_16 [1] : vector<16x32xf32> to vector<16xf32>
      %20 = vector.shape_cast %19 : vector<16xf32> to vector<16x1xf32>
      %cst_17 = arith.constant 3.200000e+01 : f32
      %21 = vector.broadcast %cst_17 : f32 to vector<16x1xf32>
      %22 = arith.divf %20, %21 : vector<16x1xf32>
      %23 = vector.broadcast %22 : vector<16x1xf32> to vector<16x32xf32>
      %24 = arith.subf %18, %23 : vector<16x32xf32>
      %25 = arith.mulf %24, %24 : vector<16x32xf32>
      %cst_18 = arith.constant dense<0.000000e+00> : vector<16xf32>
      %26 = vector.multi_reduction <add>, %25, %cst_18 [1] : vector<16x32xf32> to vector<16xf32>
      %27 = vector.shape_cast %26 : vector<16xf32> to vector<16x1xf32>
      %cst_19 = arith.constant 3.200000e+01 : f32
      %28 = vector.broadcast %cst_19 : f32 to vector<16x1xf32>
      %29 = arith.divf %27, %28 : vector<16x1xf32>
      %cst_20 = arith.constant 9.99999996E-13 : f32
      %30 = vector.broadcast %cst_20 : f32 to vector<16x1xf32>
      %31 = arith.addf %29, %30 : vector<16x1xf32>
      %32 = math.rsqrt %31 : vector<16x1xf32>
      %33 = vector.broadcast %22 : vector<16x1xf32> to vector<16x32xf32>
      %34 = arith.subf %18, %33 : vector<16x32xf32>
      %35 = vector.broadcast %32 : vector<16x1xf32> to vector<16x32xf32>
      %36 = arith.mulf %34, %35 : vector<16x32xf32>
      %c0_21 = arith.constant 0 : index
      %c0_22 = arith.constant 0 : index
      %37 = vector.load %arg6[%c0_21, %c0_22] : memref<1x32xf32, #tpu.memory_space<vmem>>, vector<1x32xf32>
      %38 = vector.broadcast %37 : vector<1x32xf32> to vector<16x32xf32>
      %39 = arith.mulf %36, %38 : vector<16x32xf32>
      %c0_23 = arith.constant 0 : index
      %c0_24 = arith.constant 0 : index
      %40 = vector.load %arg7[%c0_23, %c0_24] : memref<1x32xf32, #tpu.memory_space<vmem>>, vector<1x32xf32>
      %41 = vector.broadcast %40 : vector<1x32xf32> to vector<16x32xf32>
      %42 = arith.addf %39, %41 : vector<16x32xf32>
      %43 = arith.truncf %42 : vector<16x32xf32> to vector<16x32xbf16>
      %c0_25 = arith.constant 0 : index
      %c0_26 = arith.constant 0 : index
      %44 = vector.load %arg8[%c0_25, %c0_26] : memref<16x32xbf16, #tpu.memory_space<vmem>>, vector<16x32xbf16>
      tpu.vector_store %arg8[%c0_25, %c0_26], %43 {strides = array<i32>} : memref<16x32xbf16, #tpu.memory_space<vmem>>, vector<16x32xbf16>,
    } else {
    }
    return
  }
  func.func @transform_0(%arg0: i32, %arg1: i32) -> (i32, i32) {
    %c0_i32 = arith.constant 0 : i32
    return %arg0, %arg1 : i32, i32
  }
  func.func @transform_1(%arg0: i32, %arg1: i32) -> (i32, i32) {
    %c0_i32 = arith.constant 0 : i32
    %c0_i32_0 = arith.constant 0 : i32
    return %arg1, %c0_i32 : i32, i32
  }
  func.func @transform_2(%arg0: i32, %arg1: i32) -> (i32, i32) {
    %c0_i32 = arith.constant 0 : i32
    %c0_i32_0 = arith.constant 0 : i32
    %c0_i32_1 = arith.constant 0 : i32
    return %c0_i32, %c0_i32_0 : i32, i32
  }
  func.func @transform_3(%arg0: i32, %arg1: i32) -> (i32, i32) {
    %c0_i32 = arith.constant 0 : i32
    %c0_i32_0 = arith.constant 0 : i32
    return %arg0, %c0_i32 : i32, i32
  }
  func.func @transform_4(%arg0: i32, %arg1: i32) -> (i32, i32) {
    %c0_i32 = arith.constant 0 : i32
    %c0_i32_0 = arith.constant 0 : i32
    %c0_i32_1 = arith.constant 0 : i32
    return %c0_i32, %c0_i32_0 : i32, i32
  }
  func.func @transform_5(%arg0: i32, %arg1: i32) -> (i32, i32) {
    %c0_i32 = arith.constant 0 : i32
    %c0_i32_0 = arith.constant 0 : i32
    %c0_i32_1 = arith.constant 0 : i32
    return %c0_i32, %c0_i32_0 : i32, i32
  }
  func.func @transform_6(%arg0: i32, %arg1: i32) -> (i32, i32) {
    %c0_i32 = arith.constant 0 : i32
    %c0_i32_0 = arith.constant 0 : i32
    return %arg0, %c0_i32 : i32, i32
  }
}

</mosaic_0001>

<bundles_post_ra>
// kernel: _lambda_.11
= control target key start
LH: loop header
LB: loop body
LE: loop exit
PB: predicated region body
PF: predicated region fallthrough
CT: control target
= control target key end

     0   :  { %vm16_vm0 = vcmask 261120   ;;  %vm70_vm1 = vcmask 257024   ;;  %s129_s0 = inlined_call_operand.vmem [shape: f32[16,32], index: 0, kind: input, shape index: {}]   ;;  %s130_s1 = inlined_call_operand.vmem [shape: f32[1,32], index: 1, kind: input, shape index: {}]   ;;  %s131_s2 = inlined_call_operand.vmem [shape: f32[1,32], index: 2, kind: input, shape index: {}]   ;;  %s132_s3 = inlined_call_operand.vmem [shape: bf16[16,32], index: 3, kind: output, shape index: {}]  }
   0x1   :  { %v14_v0 = vld [vmem:[%s129_s0] sm:$0xff]  ;;  %v15_v1 = vld [vmem:[%s129_s0 + $0x8] sm:$0xff] }
   0x2   :  { %v17_v2 = vsel %vm16_vm0, %v14_v0, 0.0  ;;  %v20_v3 = vsel %vm16_vm0, %v15_v1, 0.0  ;;  %v77_v21 = vld [vmem:[%s130_s1] ss:$0 sm:$0xff] }
   0x3   :  { %18 = vadd.xlane.f32.xlu0 %v17_v2  ;;  %v78_v23 = vld [vmem:[%s131_s2] ss:$0 sm:$0xff] }
   0x7   :  { %21 = vadd.xlane.f32.xlu0 %v20_v3 }
  0x90   :  { %v19_v4 = vpop.xlane.xlu0 %18 }
  0x91   :  { %v24_v5 = vmul.f32 0.03125, %v19_v4 }
  0x93   :  { %v26_v6 = vsub.f32 %v14_v0, %v24_v5 }
  0x94   :  { %v22_v7 = vpop.xlane.xlu0 %21 }
  0x95   :  { %v25_v8 = vmul.f32 0.03125, %v22_v7  ;;  %v28_v9 = vmul.f32 %v26_v6, %v26_v6 }
  0x97   :  { %v27_v10 = vsub.f32 %v15_v1, %v25_v8  ;;  %v30_v11 = vsel %vm16_vm0, %v28_v9, 0.0 }
  0x98   :  { %31 = vadd.xlane.f32.xlu1 %v30_v11 }
  0x99   :  { %v29_v12 = vmul.f32 %v27_v10, %v27_v10 }
  0x9b   :  { %v33_v13 = vsel %vm16_vm0, %v29_v12, 0.0 }
  0x9c   :  { %34 = vadd.xlane.f32.xlu1 %v33_v13 }
 0x125   :  { %v32_v14 = vpop.xlane.xlu1 %31 }
 0x126   :  { %v36_v15 = vmul.f32 0.03125, %v32_v14 }
 0x128   :  { %v38_v16 = vadd.f32 1e-12, %v36_v15 }
 0x129   :  { %v35_v17 = vpop.xlane.xlu1 %34 }
 0x12a   :  { %83 = vrsqrt.f32 %v38_v16  ;;  %v37_v18 = vmul.f32 0.03125, %v35_v17 }
 0x12c   :  { %v39_v19 = vadd.f32 1e-12, %v37_v18 }
 0x12e   :  { %85 = vrsqrt.f32 %v39_v19 }
 0x134   :  { %v84_v20 = vpop.eup %83 }
 0x135   :  { %v42_v22 = vmul.f32 %v84_v20, %v26_v6 }
 0x137   :  { %v51_v24 = vmul.f32 %v77_v21, %v42_v22 }
 0x138   :  { %v86_v25 = vpop.eup %85 }
 0x139   :  { %v60_v26 = vadd.f32 %v78_v23, %v51_v24  ;;  %v43_v27 = vmul.f32 %v86_v25, %v27_v10 }
 0x13b   :  { %v81_v28 = vpack.c.bf16 %v60_v26, %v60_v26  ;;  %v52_v29 = vmul.f32 %v77_v21, %v43_v27 }
 0x13d   :  { %71 = vst.msk [vmem:[%s132_s3] sm:$0xf] %vm70_vm1, %v81_v28  ;;  %v61_v30 = vadd.f32 %v78_v23, %v52_v29 }
 0x13f   :  { %v82_v31 = vpack.c.bf16 %v61_v30, %v61_v30 }
 0x141   :  { %72 = vst.msk [vmem:[%s132_s3 + $0x4] sm:$0xf] %vm70_vm1, %v82_v31 }

// kernel: _lambda_.12
= control target key start
LH: loop header
LB: loop body
LE: loop exit
PB: predicated region body
PF: predicated region fallthrough
CT: control target
= control target key end

     0   :  { %s597_s12 = smov 0   ;;  %s599_s13 = smov 0   ;;  %s641_s0 = inlined_call_operand.vmem [shape: bf16[16,32], index: 0, kind: input, shape index: {}]   ;;  %s642_s1 = inlined_call_operand.vmem [shape: bf16[3,32,32], index: 1, kind: input, shape index: {}]   ;;  %s643_s2 = inlined_call_operand.vmem [shape: f32[3,1,32], index: 2, kind: input, shape index: {}]   ;;  %s644_s3 = inlined_call_operand.vmem [shape: bf16[3,16,32], index: 3, kind: output, shape index: {}]  }
   0x1   :  { %s601_s14 = smov 0  }
   0x2 LB: > { %s28_s15 = sadd.s32 1, %s569_s13  ;;  %p493_p0 = scmp.ge.s32.totalorder %s573_s14, 1  ;;  %s573_s14 = sphi %s601_s14, %s13_s14   ;;  %s569_s13 = sphi %s599_s13, %s646_s13   ;;  %s565_s12 = sphi %s597_s12, %s645_s12  }
   0x3   : > { %p30_p1 = scmp.ge.s32.totalorder %s28_s15, 3  ;;  %p189_p2 = scmp.lt.s32.totalorder %s573_s14, 4 }
   0x5   : > { %s648_s15 = smov (%p30_p1, %s28_s15), 0  ;;  %p190_p3 = pnand %p493_p0, %p189_p2 }
   0x6   : > { %p242_p4 = scmp.lt.s32.totalorder (!%p190_p3), %s565_s12, 2  ;;  %vm269_vm0 = vcmask (!%p190_p3), 261120   ;;  %v575_v0 = vmov (!%p190_p3), 0.0   ;;  %vm576_vm1 = vmmov (!%p190_p3), 0   ;;  %v550_v3 = vld [vmem:[%s641_s0] sm:$0xff] (!%p190_p3)   ;;  %vm368_vm2 = vcmask (!%p190_p3), 257024  }
   0x7   : > { %193 = sbr.rel (%p190_p3) target bundleno = 254 (0xfe), region = 32  ;;  %514 = vmatprep.subr.bf16.mxu0 (!%p190_p3), %v575_v0  ;;  %518 = vmatprep.mubr.msk.bf16.mxu0 (!%p190_p3), %vm576_vm1, %v575_v0  ;;  %270 = vst.msk [vmem:[#allocation2] sm:$0xff] (!%p190_p3), %vm269_vm0, %v575_v0  ;;  %271 = vst.msk [vmem:[#allocation2 + $0x8] sm:$0xff] (!%p190_p3), %vm269_vm0, %v575_v0 }
   0xe   : > { %s650_s12 = smov (!%p242_p4, %s565_s12), 2  ;;  %v272_v4 = vld [vmem:[#allocation2] sm:$0xff]  ;;  %v273_v6 = vld [vmem:[#allocation2 + $0x8] sm:$0xff] }
   0xf   : > { %s507_s16 = sshll.u32 %s650_s12, 4  ;;  %s253_s24 = scalar_lea.vmem %s643_s2, %s650_s12 }
  0x10   : > { %s249_s19 = scalar_lea.vmem %s642_s1, %s507_s16  ;;  %v502_v12 = vld [vmem:[%s253_s24] ss:$0 sm:$0xff]  ;;  %s508_s25 = sshll.u32 %s650_s12, 3 }
  0x11   : > { %v548_v1 = vld [vmem:[%s249_s19] sm:$0xff]   ;;  %v549_v2 = vld [vmem:[%s249_s19 + $0x8] sm:$0xff]   ;;  %s262_s28 = scalar_lea.vmem %s644_s3, %s508_s25 }
  0x12   : > { %515 = vmatpush3.bf16.msra.mxu0 %v548_v1 }
  0x13   : > { %516 = vmatprep.subr.bf16.mxu0 %v575_v0 }
  0x16   : > { %517 = vmatpush3.bf16.msra.mxu0 %v549_v2 }
  0x19   : > { %519 = vmatmul.mubr.msk.bf16.vlgmr.msra.gmra.mrb[0].mxu0 %vm269_vm0, %v550_v3 }
  0xec   : > { %v335_v5 = vpop.f32.mrb[0].mxu0 }
  0xed   : > { %v342_v7 = vadd.f32 %v335_v5, %v272_v4  ;;  %v520_v8 = vpop.f32.mrb[1].mxu0 }
  0xee   : > { %v338_v9 = vpop.f32.mrb[2].mxu0 }
  0xef   : > { %344 = vst.msk [vmem:[#allocation2] sm:$0xff] %vm269_vm0, %v342_v7  ;;  %v343_v10 = vadd.f32 %v338_v9, %v273_v6  ;;  %v521_v11 = vpop.f32.mrb[3].mxu0 }
  0xf1   : > { %345 = vst.msk [vmem:[#allocation2 + $0x8] sm:$0xff] %vm269_vm0, %v343_v10 }
  0xf6   : > { %v349_v13 = vld [vmem:[#allocation2] sm:$0xff] }
  0xf7   : > { %v358_v14 = vadd.f32 %v502_v12, %v349_v13 }
  0xf8   : > { %v350_v15 = vld [vmem:[#allocation2 + $0x8] sm:$0xff] }
  0xf9   : > { %v509_v16 = vpack.c.bf16 %v358_v14, %v358_v14  ;;  %v359_v17 = vadd.f32 %v502_v12, %v350_v15 }
  0xfb   : > { %369 = vst.msk [vmem:[%s262_s28] sm:$0xf] %vm368_vm2, %v509_v16  ;;  %v510_v18 = vpack.c.bf16 %v359_v17, %v359_v17 }
  0xfd   : > { %370 = vst.msk [vmem:[%s262_s28 + $0x4] sm:$0xf] %vm368_vm2, %v510_v18 }
  0xfe PF: > { %s13_s14 = sadd.s32 1, %s573_s14   ;;  %s645_s12 = smov %s569_s13 }
  0xff   : > { %p10_p5 = scmp.ge.s32.totalorder %s13_s14, 5   ;;  %s646_s13 = smov %s648_s15 }
 0x101   :  { %12 = sbr.rel (!%p10_p5) target bundleno = 2 (0x2), region = 76 }

// kernel: _lambda_.14
= control target key start
LH: loop header
LB: loop body
LE: loop exit
PB: predicated region body
PF: predicated region fallthrough
CT: control target
= control target key end

     0   :  { %vm28_vm0 = vcmask 261120   ;;  %v220_v0 = vmov 0.0   ;;  %vm221_vm1 = vmmov 0   ;;  %vm178_vm2 = vcmask 257024   ;;  %s293_s1 = inlined_call_operand.vmem [shape: bf16[32,32], index: 1, kind: input, shape index: {}]   ;;  %s294_s0 = inlined_call_operand.vmem [shape: bf16[16,32], index: 0, kind: input, shape index: {}]   ;;  %s295_s3 = inlined_call_operand.vmem [shape: bf16[16,32], index: 3, kind: input, shape index: {}]   ;;  %s296_s2 = inlined_call_operand.vmem [shape: f32[1,32], index: 2, kind: input, shape index: {}, may-alias: {2,5}]   ;;  %s297_s4 = inlined_call_operand.vmem [shape: f32[1,32], index: 4, kind: input, shape index: {}]   ;;  %s298_s5 = inlined_call_operand.vmem [shape: f32[1,32], index: 5, kind: input, shape index: {}, may-alias: {2,5}]   ;;  %s299_s6 = inlined_call_operand.vmem [shape: bf16[16,32], index: 6, kind: output, shape index: {}]  }
   0x1   :  { %203 = vmatprep.subr.bf16.mxu0 %v220_v0  ;;  %v213_v1 = vld [vmem:[%s293_s1] sm:$0xff]   ;;  %207 = vmatprep.mubr.msk.bf16.mxu0 %vm221_vm1, %v220_v0  ;;  %29 = vst.msk [vmem:[#allocation2] sm:$0xff] %vm28_vm0, %v220_v0  ;;  %30 = vst.msk [vmem:[#allocation2 + $0x8] sm:$0xff] %vm28_vm0, %v220_v0  ;;  %v214_v2 = vld [vmem:[%s293_s1 + $0x8] sm:$0xff]  }
   0x2   :  { %204 = vmatpush3.bf16.msra.mxu0 %v213_v1  ;;  %v215_v3 = vld [vmem:[%s294_s0] sm:$0xff]  }
   0x3   :  { %205 = vmatprep.subr.bf16.mxu0 %v220_v0  ;;  %v197_v12 = vld [vmem:[%s295_s3] sm:$0xff]  }
   0x4   :  { %v189_v13 = vld [vmem:[%s296_s2] ss:$0 sm:$0xff]  ;;  %v198_v14 = vunpack.c.l.bf16 %v197_v12  ;;  %v199_v17 = vunpack.c.h.bf16 %v197_v12 }
   0x5   :  { %v190_v41 = vld [vmem:[%s297_s4] ss:$0 sm:$0xff] }
   0x6   :  { %206 = vmatpush3.bf16.msra.mxu0 %v214_v2  ;;  %v191_v43 = vld [vmem:[%s298_s5] ss:$0 sm:$0xff] }
   0x8   :  { %v31_v4 = vld [vmem:[#allocation2] sm:$0xff]  ;;  %v32_v6 = vld [vmem:[#allocation2 + $0x8] sm:$0xff] }
   0x9   :  { %208 = vmatmul.mubr.msk.bf16.vlgmr.msra.gmra.mrb[0].mxu0 %vm28_vm0, %v215_v3 }
  0xdc   :  { %v94_v5 = vpop.f32.mrb[0].mxu0 }
  0xdd   :  { %v101_v7 = vadd.f32 %v94_v5, %v31_v4  ;;  %v209_v8 = vpop.f32.mrb[1].mxu0 }
  0xde   :  { %v97_v9 = vpop.f32.mrb[2].mxu0 }
  0xdf   :  { %103 = vst.msk [vmem:[#allocation2] sm:$0xff] %vm28_vm0, %v101_v7  ;;  %v102_v10 = vadd.f32 %v97_v9, %v32_v6  ;;  %v210_v11 = vpop.f32.mrb[3].mxu0 }
  0xe1   :  { %104 = vst.msk [vmem:[#allocation2 + $0x8] sm:$0xff] %vm28_vm0, %v102_v10 }
  0xe6   :  { %v108_v15 = vld [vmem:[#allocation2] sm:$0xff] }
  0xe7   :  { %v117_v16 = vadd.f32 %v189_v13, %v108_v15 }
  0xe8   :  { %v109_v18 = vld [vmem:[#allocation2 + $0x8] sm:$0xff] }
  0xe9   :  { %v123_v19 = vadd.f32 %v198_v14, %v117_v16  ;;  %v118_v20 = vadd.f32 %v189_v13, %v109_v18 }
  0xeb   :  { %v125_v21 = vsel %vm28_vm0, %v123_v19, 0.0  ;;  %v124_v22 = vadd.f32 %v199_v17, %v118_v20 }
  0xec   :  { %126 = vadd.xlane.f32.xlu0 %v125_v21 }
  0xed   :  { %v128_v23 = vsel %vm28_vm0, %v124_v22, 0.0 }
  0xf0   :  { %129 = vadd.xlane.f32.xlu0 %v128_v23 }
 0x179   :  { %v127_v24 = vpop.xlane.xlu0 %126 }
 0x17a   :  { %v132_v25 = vmul.f32 0.03125, %v127_v24 }
 0x17c   :  { %v134_v26 = vsub.f32 %v123_v19, %v132_v25 }
 0x17d   :  { %v130_v27 = vpop.xlane.xlu0 %129 }
 0x17e   :  { %v133_v28 = vmul.f32 0.03125, %v130_v27  ;;  %v136_v29 = vmul.f32 %v134_v26, %v134_v26 }
 0x180   :  { %v135_v30 = vsub.f32 %v124_v22, %v133_v28  ;;  %v138_v31 = vsel %vm28_vm0, %v136_v29, 0.0 }
 0x181   :  { %139 = vadd.xlane.f32.xlu1 %v138_v31 }
 0x182   :  { %v137_v32 = vmul.f32 %v135_v30, %v135_v30 }
 0x184   :  { %v141_v33 = vsel %vm28_vm0, %v137_v32, 0.0 }
 0x185   :  { %142 = vadd.xlane.f32.xlu1 %v141_v33 }
 0x20e   :  { %v140_v34 = vpop.xlane.xlu1 %139 }
 0x20f   :  { %v144_v35 = vmul.f32 0.03125, %v140_v34 }
 0x211   :  { %v146_v36 = vadd.f32 1e-12, %v144_v35 }
 0x212   :  { %v143_v37 = vpop.xlane.xlu1 %142 }
 0x213   :  { %216 = vrsqrt.f32 %v146_v36  ;;  %v145_v38 = vmul.f32 0.03125, %v143_v37 }
 0x215   :  { %v147_v39 = vadd.f32 1e-12, %v145_v38 }
 0x217   :  { %218 = vrsqrt.f32 %v147_v39 }
 0x21d   :  { %v217_v40 = vpop.eup %216 }
 0x21e   :  { %v150_v42 = vmul.f32 %v217_v40, %v134_v26 }
 0x220   :  { %v159_v44 = vmul.f32 %v190_v41, %v150_v42 }
 0x221   :  { %v219_v45 = vpop.eup %218 }
 0x222   :  { %v168_v46 = vadd.f32 %v191_v43, %v159_v44  ;;  %v151_v47 = vmul.f32 %v219_v45, %v135_v30 }
 0x224   :  { %v194_v48 = vpack.c.bf16 %v168_v46, %v168_v46  ;;  %v160_v49 = vmul.f32 %v190_v41, %v151_v47 }
 0x226   :  { %179 = vst.msk [vmem:[%s299_s6] sm:$0xf] %vm178_vm2, %v194_v48  ;;  %v169_v50 = vadd.f32 %v191_v43, %v160_v49 }
 0x228   :  { %v195_v51 = vpack.c.bf16 %v169_v50, %v169_v50 }
 0x22a   :  { %180 = vst.msk [vmem:[%s299_s6 + $0x4] sm:$0xf] %vm178_vm2, %v195_v51 }

// kernel: _lambda_.13
= control target key start
LH: loop header
LB: loop body
LE: loop exit
PB: predicated region body
PF: predicated region fallthrough
CT: control target
= control target key end

     0   :  { %s1267_s15 = smov 0   ;;  %s1269_s16 = smov 0   ;;  %s1444_s0 = inlined_call_operand.vmem [shape: bf16[3,2,8,32], index: 0, kind: input, shape index: {}, may-alias: {0,1,2}]   ;;  %s1445_s1 = inlined_call_operand.vmem [shape: bf16[3,2,8,32], index: 1, kind: input, shape index: {}, may-alias: {0,1,2}]   ;;  %s1446_s2 = inlined_call_operand.vmem [shape: bf16[3,2,8,32], index: 2, kind: input, shape index: {}, may-alias: {0,1,2}]   ;;  %s1447_s3 = inlined_call_operand.vmem [shape: f32[2,1,8], index: 3, kind: input, shape index: {}]   ;;  %s1448_s4 = inlined_call_operand.vmem [shape: bf16[2,8,32], index: 4, kind: output, shape index: {}]  }
   0x1   :  { %s1271_s17 = smov 0  }
   0x2 LB: > { %s33_s18 = sadd.s32 1, %s1226_s16  ;;  %p1061_p0 = scmp.ge.s32.totalorder %s1230_s17, 1  ;;  %s1230_s17 = sphi %s1271_s17, %s14_s17   ;;  %s1226_s16 = sphi %s1269_s16, %s1450_s16   ;;  %s1222_s15 = sphi %s1267_s15, %s1449_s15  }
   0x3   : > { %p35_p1 = scmp.ge.s32.totalorder %s33_s18, 2  ;;  %p230_p2 = scmp.lt.s32.totalorder %s1230_s17, 3 }
   0x5   : > { %s1452_s18 = smov (%p35_p1, %s33_s18), 0  ;;  %p231_p3 = pnand %p1061_p0, %p230_p2 }
   0x6   : > { %p282_p4 = scmp.lt.s32.totalorder (!%p231_p3), %s1222_s15, 1  ;;  %v1232_v0 = vmov (!%p231_p3), 0.0   ;;  %vm1233_vm0 = vmmov (!%p231_p3), 0   ;;  %vm344_vm1 = vcmask (!%p231_p3), 64512   ;;  %vm323_vm2 = vcmask (!%p231_p3), 7168   ;;  %s1236_s29 = smov (!%p231_p3), 120  }
   0x7   : > { %234 = sbr.rel (%p231_p3) target bundleno = 1415 (0x587), region = 36  ;;  %1098 = vmatprep.subr.bf16.mxu0 (!%p231_p3), %v1232_v0  ;;  %1100 = vmatprep.mubr.msk.bf16.mxu0 (!%p231_p3), %vm1233_vm0, %v1232_v0  ;;  %v1234_v4 = vmov (!%p231_p3), -1e+30   ;;  %328 = vst.msk [vmem:[#allocation3] sm:$0xff] (!%p231_p3), %vm323_vm2, %v1232_v0  ;;  %329 = vst.msk [vmem:[#allocation3 + $0x8] sm:$0xff] (!%p231_p3), %vm323_vm2, %v1232_v0  ;;  %v1235_v12 = vmov (!%p231_p3), 0  }
   0x8   : > { %1104 = vmatprep.subr.bf16.mxu1 (!%p231_p3), %v1232_v0  ;;  %1106 = vmatprep.mubr.msk.bf16.mxu1 (!%p231_p3), %vm1233_vm0, %v1232_v0  ;;  %324 = vst.msk [vmem:[#allocation2] sm:$0xff] (!%p231_p3), %vm323_vm2, %v1234_v4  ;;  %325 = vst.msk [vmem:[#allocation2 + $0x8] sm:$0xff] (!%p231_p3), %vm323_vm2, %v1234_v4  ;;  %s1237_s30 = smov (!%p231_p3), 112   ;;  %s1238_s5 = smov (!%p231_p3), 104   ;;  %vm420_vm3 = vcmask (!%p231_p3), 1043456   ;;  %vm332_vm4 = vcmask (!%p231_p3), 261120  }
   0x9   : > { %326 = vst.msk [vmem:[#allocation2 + $0x10] sm:$0xff] (!%p231_p3), %vm323_vm2, %v1234_v4  ;;  %327 = vst.msk [vmem:[#allocation2 + $0x18] sm:$0xff] (!%p231_p3), %vm323_vm2, %v1234_v4  ;;  %1180 = vset.pattern.permute.xlu0 (!%p231_p3), %v1235_v12  ;;  %1181 = vset.pattern.permute.xlu1 (!%p231_p3), %v1235_v12  ;;  %s1239_s9 = smov (!%p231_p3), 8   ;;  %s1240_s10 = smov (!%p231_p3), 16   ;;  %vm881_vm5 = vcmask (!%p231_p3), 130048   ;;  %vm883_vm6 = vcmask (!%p231_p3), 195584  }
   0xa   : > { %330 = vst.msk [vmem:[#allocation3 + $0x10] sm:$0xff] (!%p231_p3), %vm323_vm2, %v1232_v0  ;;  %331 = vst.msk [vmem:[#allocation3 + $0x18] sm:$0xff] (!%p231_p3), %vm323_vm2, %v1232_v0  ;;  %s1241_s11 = smov (!%p231_p3), 24   ;;  %vm930_vm7 = vcmask (!%p231_p3), 257024  }
   0xb   : > { %333 = vst.msk [vmem:[#allocation4] sm:$0xff] (!%p231_p3), %vm332_vm4, %v1232_v0 }
   0xe   : > { %s1454_s15 = smov (!%p282_p4, %s1222_s15), 1 }
   0xf   : > { %s1291_s19 = sshll.u32 %s1454_s15, 2  ;;  %s310_s28 = scalar_lea.vmem %s1447_s3, %s1454_s15  ;;  %v1331_v15 = vld [vmem:[#allocation2] sm:$0xff]  ;;  %v526_v57 = vld [vmem:[#allocation2 + $0x8] sm:$0xff] }
  0x10   : > { %s991_s22 = scalar_lea.vmem %s1445_s1, %s1291_s19  ;;  %s288_s25 = scalar_lea.vmem %s1444_s0, %s1291_s19  ;;  %v1321_v5 = vld [vmem:[%s310_s28] ss:$0 sm:$0xff]  ;;  %v1378_v61 = vld [vmem:[#allocation2 + $0x10] sm:$0xff] }
  0x11   : > { %v1067_v1 = vld [vmem:[%s991_s22 + $0x8] sm:$0xf]  ;;  %v341_v3 = vld [vmem:[%s288_s25] sm:$0xf]  ;;  %s995_s8 = scalar_lea.vmem %s1446_s2, %s1291_s19  ;;  %s317_s14 = scalar_lea.vmem %s1448_s4, %s1291_s19 }
  0x12   : > { %v349_v2 = vsel %vm344_vm1, %v1067_v1, 0  ;;  %v1072_v13 = vcombine.low %v1067_v1, %v1067_v1  ;;  %v1071_v14 = vcombine.low %v341_v3, %v341_v3  ;;  %v1345_v19 = vld [vmem:[%s995_s8 + $0x10] sm:$0xf] }
  0x13   : > { %1099 = vmatpush3.bf16.xpose.msra.mxu0 %v349_v2  ;;  %v422_v20 = vsel %vm420_vm3, %v1345_v19, 0  ;;  %v789_v2 = vld [vmem:[#allocation2 + $0x18] sm:$0xff] }
  0x14   : > { %1116 = vmatprep.subr.bf16.mxu0 %v1232_v0  ;;  %477 = vrot.lane.b32.xlu1 %v1072_v13, %s1236_s29 }
  0x15   : > { %1105 = vmatpush3.bf16.msra.mxu1 %v422_v20 }
  0x16   : > { %1110 = vmatprep.subr.bf16.mxu1 %v1232_v0 }
  0x18   : > { %472 = vrot.lane.b32.xlu1 %v1071_v14, %s1236_s29 }
  0x1a   : > { %1101 = vmatmul.mubr.msk.bf16.vlgmr.msra.gmra.mrb[0].mxu0 %vm344_vm1, %v341_v3 }
  0x1b   : > { %1118 = vmatprep.mubr.msk.bf16.mxu0 %vm1233_vm0, %v1232_v0 }
  0x1c   : > { %610 = vrot.lane.b32.xlu1 %v1072_v13, %s1237_s30 }
  0x20   : > { %608 = vrot.lane.b32.xlu1 %v1071_v14, %s1237_s30 }
  0x24   : > { %740 = vrot.lane.b32.xlu1 %v1072_v13, %s1238_s5 }
  0x28   : > { %738 = vrot.lane.b32.xlu1 %v1071_v14, %s1238_s5 }
  0x86   : > { %v478_v24 = vpop.permute.xlu1 %477 }
  0x87   : > { %v483_v27 = vsel %vm344_vm1, %v478_v24, 0 }
  0x8a   : > { %v473_v25 = vpop.permute.xlu1 %472 }
  0x8e   : > { %v611_v29 = vpop.permute.xlu1 %610 }
  0x8f   : > { %v616_v31 = vsel %vm344_vm1, %v611_v29, 0 }
  0x92   : > { %v609_v30 = vpop.permute.xlu1 %608 }
  0x96   : > { %v741_v32 = vpop.permute.xlu1 %740 }
  0x97   : > { %v746_v33 = vsel %vm344_vm1, %v741_v32, 0 }
  0x9a   : > { %v739_v34 = vpop.permute.xlu1 %738 }
  0xed   : > { %v385_v6 = vpop.f32.mrb[0].mxu0 }
  0xee   : > { %v386_v7 = vadd.f32 %v1321_v5, %v385_v6  ;;  %v1102_v8 = vpop.f32.mrb[1].mxu0 }
  0xef   : > { %v388_v9 = vpop.f32.mrb[2].mxu0 }
  0xf0   : > { %v1103_v10 = vpop.f32.mrb[3].mxu0  ;;  %v392_v11 = vsel %vm344_vm1, %v386_v7, -inf }
  0xf1   : > { %393 = vmax.xlane.f32.xlu0 %v392_v11 }
 0x17e   : > { %v394_v16 = vpop.xlane.xlu0 %393 }
 0x17f   : > { %v1334_v17 = vmax.f32 %v1331_v15, %v394_v16 }
 0x181   : > { %v396_v18 = vsub.f32 %v1331_v15, %v1334_v17  ;;  %415 = vst.msk [vmem:[#allocation2] sm:$0xff] %vm323_vm2, %v1334_v17  ;;  %401 = vperm.xlu0 %1180, %v1334_v17  }
 0x200   : > { %v402_v21 = vpop.permute.xlu0 %401 }
 0x201   : > { %v404_v22 = vsub.f32 %v386_v7, %v402_v21 }
 0x203   : > { %v405_v23 = vmul.f32 1.442695, %v404_v22 }
 0x205   : > { %1184 = vpow2.f32 %v405_v23 }
 0x20f   : > { %v1350_v26 = vpop.eup %1184 }
 0x210   : > { %v416_v28 = vpack.c.bf16 %v1350_v26, %v1350_v26  ;;  %v409_v7 = vsel %vm344_vm1, %v1350_v26, 0.0 }
 0x212   : > { %1107 = vmatmul.mubr.msk.bf16.vlgmr.msra.gmra.mrb[0].mxu1 %vm344_vm1, %v416_v28 }
 0x213   : > { %1111 = vmatpush3.bf16.xpose.msra.mxu1 %v483_v27  ;;  %1112 = vmatprep.mubr.msk.bf16.mxu1 %vm1233_vm0, %v1232_v0 }
 0x214   : > { %1122 = vmatprep.subr.bf16.mxu1 %v1232_v0 }
 0x21a   : > { %1113 = vmatmul.mubr.msk.bf16.vlgmr.msra.gmra.mrb[4].mxu1 %vm344_vm1, %v473_v25 }
 0x21b   : > { %1123 = vmatpush3.bf16.xpose.msra.mxu1 %v616_v31  ;;  %1124 = vmatprep.mubr.msk.bf16.mxu1 %vm1233_vm0, %v1232_v0 }
 0x21c   : > { %1134 = vmatprep.subr.bf16.mxu1 %v1232_v0 }
 0x222   : > { %1125 = vmatmul.mubr.msk.bf16.vlgmr.msra.gmra.mrb[8].mxu1 %vm344_vm1, %v609_v30 }
 0x223   : > { %1135 = vmatpush3.bf16.xpose.msra.mxu1 %v746_v33  ;;  %1136 = vmatprep.mubr.msk.bf16.mxu1 %vm1233_vm0, %v1232_v0 }
 0x22a   : > { %1137 = vmatmul.mubr.msk.bf16.vlgmr.msra.gmra.mrb[12].mxu1 %vm344_vm1, %v739_v34 }
 0x2e5   : > { %v1369_v35 = vpop.f32.mrb[0].mxu1 }
 0x2e6   : > { %v1108_v36 = vpop.f32.mrb[1].mxu1 }
 0x2e7   : > { %v461_v37 = vpop.f32.mrb[2].mxu1 }
 0x2e8   : > { %v1109_v38 = vpop.f32.mrb[3].mxu1 }
 0x2e9   : > { %v397_v38 = vmul.f32 1.442695, %v396_v18 }
 0x2ed   : > { %v519_v39 = vpop.f32.mrb[4].mxu1 }
 0x2ee   : > { %v520_v40 = vadd.f32 %v1321_v5, %v519_v39  ;;  %v1114_v41 = vpop.f32.mrb[5].mxu1 }
 0x2ef   : > { %v522_v42 = vpop.f32.mrb[6].mxu1 }
 0x2f0   : > { %v1115_v43 = vpop.f32.mrb[7].mxu1  ;;  %v527_v44 = vsel %vm344_vm1, %v520_v40, -inf }
 0x2f1   : > { %528 = vmax.xlane.f32.xlu1 %v527_v44  ;;  %v407_v44 = vld [vmem:[#allocation3] sm:$0xff] }
 0x2f5   : > { %v652_v45 = vpop.f32.mrb[8].mxu1 }
 0x2f6   : > { %v653_v46 = vadd.f32 %v1321_v5, %v652_v45  ;;  %v1126_v47 = vpop.f32.mrb[9].mxu1 }
 0x2f7   : > { %v655_v48 = vpop.f32.mrb[10].mxu1  ;;  %v543_v47 = vld [vmem:[#allocation3 + $0x8] sm:$0xff] }
 0x2f8   : > { %v1127_v49 = vpop.f32.mrb[11].mxu1  ;;  %v660_v50 = vsel %vm344_vm1, %v653_v46, -inf }
 0x2f9   : > { %661 = vmax.xlane.f32.xlu0 %v660_v50 }
 0x2fd   : > { %v782_v51 = vpop.f32.mrb[12].mxu1 }
 0x2fe   : > { %v783_v52 = vadd.f32 %v1321_v5, %v782_v51  ;;  %v1138_v53 = vpop.f32.mrb[13].mxu1  ;;  %v1074_v5 = vcombine.low %v1345_v19, %v1345_v19 }
 0x2ff   : > { %v785_v54 = vpop.f32.mrb[14].mxu1 }
 0x300   : > { %v1139_v55 = vpop.f32.mrb[15].mxu1  ;;  %v790_v56 = vsel %vm344_vm1, %v783_v52, -inf }
 0x301   : > { %791 = vmax.xlane.f32.xlu1 %v790_v56  ;;  %v806_v55 = vld [vmem:[#allocation3 + $0x18] sm:$0xff] }
 0x37e   : > { %v529_v58 = vpop.xlane.xlu1 %528 }
 0x37f   : > { %v530_v59 = vmax.f32 %v526_v57, %v529_v58 }
 0x381   : > { %v531_v60 = vsub.f32 %v526_v57, %v530_v59  ;;  %550 = vst.msk [vmem:[#allocation2 + $0x8] sm:$0xff] %vm323_vm2, %v530_v59  ;;  %536 = vperm.xlu1 %1181, %v530_v59  }
 0x383   : > { %v532_v29 = vmul.f32 1.442695, %v531_v60 }
 0x386   : > { %v662_v62 = vpop.xlane.xlu0 %661 }
 0x387   : > { %v1381_v63 = vmax.f32 %v1378_v61, %v662_v62 }
 0x389   : > { %v664_v1 = vsub.f32 %v1378_v61, %v1381_v63  ;;  %683 = vst.msk [vmem:[#allocation2 + $0x10] sm:$0xff] %vm323_vm2, %v1381_v63  ;;  %669 = vperm.xlu0 %1180, %v1381_v63  }
 0x38e   : > { %v792_v3 = vpop.xlane.xlu1 %791 }
 0x38f   : > { %v793_v4 = vmax.f32 %v789_v2, %v792_v3 }
 0x391   : > { %v794_v6 = vsub.f32 %v789_v2, %v793_v4  ;;  %813 = vst.msk [vmem:[#allocation2 + $0x18] sm:$0xff] %vm323_vm2, %v793_v4  ;;  %799 = vperm.xlu1 %1181, %v793_v4  }
 0x393   : > { %v795_v32 = vmul.f32 1.442695, %v794_v6 }
 0x395   : > { %555 = vrot.lane.b32.xlu1 %v1074_v5, %s1236_s29 }
 0x399   : > { %685 = vrot.lane.b32.xlu1 %v1074_v5, %s1237_s30 }
 0x39d   : > { %815 = vrot.lane.b32.xlu1 %v1074_v5, %s1238_s5 }
 0x3c1   : > { %410 = vadd.xlane.f32.xlu1 %v409_v7 }
 0x400   : > { %v537_v8 = vpop.permute.xlu1 %536 }
 0x401   : > { %v539_v9 = vsub.f32 %v520_v40, %v537_v8  ;;  %v665_v40 = vmul.f32 1.442695, %v664_v1 }
 0x403   : > { %v540_v10 = vmul.f32 1.442695, %v539_v9 }
 0x405   : > { %1186 = vpow2.f32 %v540_v10 }
 0x408   : > { %v670_v11 = vpop.permute.xlu0 %669 }
 0x409   : > { %v672_v12 = vsub.f32 %v653_v46, %v670_v11 }
 0x40b   : > { %v673_v13 = vmul.f32 1.442695, %v672_v12 }
 0x40d   : > { %1188 = vpow2.f32 %v673_v13 }
 0x40f   : > { %v1187_v14 = vpop.eup %1186 }
 0x410   : > { %v800_v16 = vpop.permute.xlu1 %799  ;;  %v545_v19 = vsel %vm344_vm1, %v1187_v14, 0.0  ;;  %v551_v25 = vpack.c.bf16 %v1187_v14, %v1187_v14 }
 0x411   : > { %v802_v20 = vsub.f32 %v783_v52, %v800_v16  ;;  %546 = vadd.xlane.f32.xlu0 %v545_v19 }
 0x413   : > { %v803_v21 = vmul.f32 1.442695, %v802_v20 }
 0x414   : > { %v556_v22 = vpop.permute.xlu1 %555 }
 0x415   : > { %1190 = vpow2.f32 %v803_v21  ;;  %v561_v23 = vsel %vm420_vm3, %v556_v22, 0 }
 0x416   : > { %1117 = vmatpush3.bf16.msra.mxu0 %v561_v23  ;;  %1192 = vpow2.f32 %v532_v29 }
 0x417   : > { %v1189_v24 = vpop.eup %1188  ;;  %1128 = vmatprep.subr.bf16.mxu0 %v1232_v0  ;;  %1194 = vpow2.f32 %v795_v32 }
 0x418   : > { %v678_v26 = vsel %vm344_vm1, %v1189_v24, 0.0  ;;  %v686_v27 = vpop.permute.xlu1 %685  ;;  %v684_v33 = vpack.c.bf16 %v1189_v24, %v1189_v24  ;;  %1196 = vpow2.f32 %v397_v38 }
 0x419   : > { %1119 = vmatmul.mubr.msk.bf16.vlgmr.msra.gmra.mrb[4].mxu0 %vm344_vm1, %v551_v25  ;;  %679 = vadd.xlane.f32.xlu1 %v678_v26  ;;  %v691_v28 = vsel %vm420_vm3, %v686_v27, 0  ;;  %1198 = vpow2.f32 %v665_v40  ;;  %v888_v27 = vld [vmem:[#allocation4] sm:$0xff] }
 0x41a   : > { %1129 = vmatpush3.bf16.msra.mxu0 %v691_v28  ;;  %1130 = vmatprep.mubr.msk.bf16.mxu0 %vm1233_vm0, %v1232_v0 }
 0x41b   : > { %1140 = vmatprep.subr.bf16.mxu0 %v1232_v0 }
 0x41c   : > { %v816_v30 = vpop.permute.xlu1 %815 }
 0x41d   : > { %v821_v34 = vsel %vm420_vm3, %v816_v30, 0 }
 0x41f   : > { %v1191_v31 = vpop.eup %1190 }
 0x420   : > { %v808_v36 = vsel %vm344_vm1, %v1191_v31, 0.0  ;;  %v814_v37 = vpack.c.bf16 %v1191_v31, %v1191_v31  ;;  %v1193_v39 = vpop.eup %1192 }
 0x421   : > { %809 = vadd.xlane.f32.xlu0 %v808_v36  ;;  %1131 = vmatmul.mubr.msk.bf16.vlgmr.msra.gmra.mrb[8].mxu0 %vm344_vm1, %v684_v33  ;;  %v1195_v41 = vpop.eup %1194  ;;  %v544_v48 = vmul.f32 %v1193_v39, %v543_v47 }
 0x422   : > { %1141 = vmatpush3.bf16.msra.mxu0 %v821_v34  ;;  %1142 = vmatprep.mubr.msk.bf16.mxu0 %vm1233_vm0, %v1232_v0  ;;  %v1197_v42 = vpop.eup %1196  ;;  %v676_v0 = vld [vmem:[#allocation3 + $0x10] sm:$0xff]  ;;  %v807_v56 = vmul.f32 %v1195_v41, %v806_v55 }
 0x423   : > { %v1199_v43 = vpop.eup %1198  ;;  %v408_v15 = vmul.f32 %v1197_v42, %v407_v44 }
 0x424   : > { %v677_v51 = vmul.f32 %v1199_v43, %v676_v0 }
 0x429   : > { %1143 = vmatmul.mubr.msk.bf16.vlgmr.msra.gmra.mrb[12].mxu0 %vm344_vm1, %v814_v37 }
 0x42a   : > { %605 = vperm.xlu1 %1181, %v1193_v39  }
 0x42e   : > { %865 = vperm.xlu1 %1181, %v1195_v41  }
 0x437   : > { %466 = vperm.xlu0 %1180, %v1197_v42  }
 0x43b   : > { %735 = vperm.xlu0 %1180, %v1199_v43  }
 0x44e   : > { %v411_v17 = vpop.xlane.xlu1 %410 }
 0x44f   : > { %v412_v18 = vadd.f32 %v411_v17, %v408_v15 }
 0x451   : > { %414 = vst.msk [vmem:[#allocation3] sm:$0xff] %vm323_vm2, %v412_v18 }
 0x458   : > { %v896_v45 = vld [vmem:[#allocation3] sm:$0xff] }
 0x459   : > { %1200 = vrcp.f32 %v896_v45 }
 0x463   : > { %v1201_v46 = vpop.eup %1200 }
 0x464   : > { %900 = vperm.xlu0 %1180, %v1201_v46  }
 0x49e   : > { %v547_v49 = vpop.xlane.xlu0 %546 }
 0x49f   : > { %v548_v50 = vadd.f32 %v547_v49, %v544_v48 }
 0x4a1   : > { %549 = vst.msk [vmem:[#allocation3 + $0x8] sm:$0xff] %vm323_vm2, %v548_v50 }
 0x4a6   : > { %v680_v52 = vpop.xlane.xlu1 %679 }
 0x4a7   : > { %v681_v53 = vadd.f32 %v680_v52, %v677_v51 }
 0x4a8   : > { %v903_v54 = vld [vmem:[#allocation3 + $0x8] sm:$0xff] }
 0x4a9   : > { %682 = vst.msk [vmem:[#allocation3 + $0x10] sm:$0xff] %vm323_vm2, %v681_v53  ;;  %1202 = vrcp.f32 %v903_v54 }
 0x4aa   : > { %v606_v13 = vpop.permute.xlu1 %605 }
 0x4ae   : > { %v810_v57 = vpop.xlane.xlu0 %809  ;;  %v866_v16 = vpop.permute.xlu1 %865 }
 0x4af   : > { %v811_v58 = vadd.f32 %v810_v57, %v807_v56 }
 0x4b0   : > { %v910_v60 = vld [vmem:[#allocation3 + $0x10] sm:$0xff] }
 0x4b1   : > { %812 = vst.msk [vmem:[#allocation3 + $0x18] sm:$0xff] %vm323_vm2, %v811_v58  ;;  %1204 = vrcp.f32 %v910_v60 }
 0x4b3   : > { %v1203_v59 = vpop.eup %1202 }
 0x4b4   : > { %907 = vperm.xlu1 %1181, %v1203_v59  }
 0x4b6   : > { %v467_v14 = vpop.permute.xlu0 %466 }
 0x4b7   : > { %v885_v21 = vsel %vm344_vm1, %v467_v14, %v606_v13 }
 0x4b8   : > { %v917_v2 = vld [vmem:[#allocation3 + $0x18] sm:$0xff] }
 0x4b9   : > { %1206 = vrcp.f32 %v917_v2 }
 0x4ba   : > { %v736_v19 = vpop.permute.xlu0 %735 }
 0x4bb   : > { %v1205_v7 = vpop.eup %1204  ;;  %v886_v23 = vsel %vm881_vm5, %v885_v21, %v736_v19 }
 0x4bc   : > { %v887_v25 = vsel %vm883_vm6, %v886_v23, %v866_v16 }
 0x4bd   : > { %v889_v30 = vmul.f32 %v888_v27, %v887_v25 }
 0x4c3   : > { %v1207_v12 = vpop.eup %1206 }
 0x4e3   : > { %v901_v22 = vpop.permute.xlu0 %900 }
 0x4ec   : > { %v597_v61 = vpop.f32.mrb[4].mxu0 }
 0x4ed   : > { %869 = vrot.lane.b32.xlu1 %v597_v61, %s1239_s9  ;;  %v1120_v62 = vpop.f32.mrb[5].mxu0 }
 0x4ee   : > { %v600_v63 = vpop.f32.mrb[6].mxu0 }
 0x4ef   : > { %v1121_v1 = vpop.f32.mrb[7].mxu0 }
 0x4f4   : > { %v727_v3 = vpop.f32.mrb[8].mxu0 }
 0x4f5   : > { %873 = vrot.lane.b32.xlu0 %v727_v3, %s1240_s10  ;;  %v1132_v4 = vpop.f32.mrb[9].mxu0 }
 0x4f6   : > { %v730_v5 = vpop.f32.mrb[10].mxu0 }
 0x4f7   : > { %v1133_v6 = vpop.f32.mrb[11].mxu0 }
 0x4f9   : > { %914 = vperm.xlu0 %1180, %v1205_v7  }
 0x4fc   : > { %v857_v8 = vpop.f32.mrb[12].mxu0 }
 0x4fd   : > { %877 = vrot.lane.b32.xlu1 %v857_v8, %s1241_s11  ;;  %v1144_v9 = vpop.f32.mrb[13].mxu0 }
 0x4fe   : > { %v860_v10 = vpop.f32.mrb[14].mxu0 }
 0x4ff   : > { %v1145_v11 = vpop.f32.mrb[15].mxu0 }
 0x501   : > { %921 = vperm.xlu1 %1181, %v1207_v12  }
 0x533   : > { %v908_v20 = vpop.permute.xlu1 %907 }
 0x534   : > { %v924_v36 = vsel %vm344_vm1, %v901_v22, %v908_v20 }
 0x55f   : > { %v870_v24 = vpop.permute.xlu1 %869 }
 0x560   : > { %v880_v28 = vsel %vm344_vm1, %v1369_v35, %v870_v24 }
 0x567   : > { %v874_v26 = vpop.permute.xlu0 %873 }
 0x568   : > { %v882_v29 = vsel %vm881_vm5, %v880_v28, %v874_v26 }
 0x56f   : > { %v878_v31 = vpop.permute.xlu1 %877 }
 0x570   : > { %v884_v32 = vsel %vm883_vm6, %v882_v29, %v878_v31 }
 0x571   : > { %v890_v33 = vadd.f32 %v889_v30, %v884_v32 }
 0x573   : > { %892 = vst.msk [vmem:[#allocation4] sm:$0xff] %vm332_vm4, %v890_v33 }
 0x578   : > { %v915_v34 = vpop.permute.xlu0 %914 }
 0x579   : > { %v925_v37 = vsel %vm881_vm5, %v924_v36, %v915_v34 }
 0x57a   : > { %v927_v39 = vld [vmem:[#allocation4] sm:$0xff] }
 0x580   : > { %v922_v38 = vpop.permute.xlu1 %921 }
 0x581   : > { %v926_v40 = vsel %vm883_vm6, %v925_v37, %v922_v38 }
 0x582   : > { %v928_v41 = vmul.f32 %v927_v39, %v926_v40 }
 0x584   : > { %v929_v35 = vpack.c.bf16 %v928_v41, %v928_v41 }
 0x586   : > { %931 = vst.msk [vmem:[%s317_s14] sm:$0xf] %vm930_vm7, %v929_v35 }
 0x587 PF: > { %s14_s17 = sadd.s32 1, %s1230_s17   ;;  %s1449_s15 = smov %s1226_s16 }
 0x588   : > { %p11_p5 = scmp.ge.s32.totalorder %s14_s17, 4   ;;  %s1450_s16 = smov %s1452_s18 }
 0x58a   :  { %13 = sbr.rel (!%p11_p5) target bundleno = 2 (0x2), region = 89 }

// kernel: _lambda_.15
= control target key start
LH: loop header
LB: loop body
LE: loop exit
PB: predicated region body
PF: predicated region fallthrough
CT: control target
= control target key end

     0   :  { %vm19_vm0 = vcmask 523264   ;;  %v173_v0 = vmov 0.0   ;;  %vm174_vm1 = vmmov 0   ;;  %vm47_vm2 = vcmask 261120   ;;  %s217_s1 = inlined_call_operand.vmem [shape: bf16[32,64], index: 1, kind: input, shape index: {}]   ;;  %s218_s0 = inlined_call_operand.vmem [shape: bf16[16,32], index: 0, kind: input, shape index: {}]   ;;  %s219_s2 = inlined_call_operand.vmem [shape: f32[1,64], index: 2, kind: input, shape index: {}]   ;;  %s220_s3 = inlined_call_operand.vmem [shape: bf16[16,64], index: 3, kind: output, shape index: {}]  }
   0x1   :  { %156 = vmatprep.subr.bf16.mxu0 %v173_v0  ;;  %v166_v1 = vld [vmem:[%s217_s1] sm:$0xff]   ;;  %160 = vmatprep.mubr.msk.bf16.mxu0 %vm174_vm1, %v173_v0  ;;  %20 = vst.msk [vmem:[#allocation2] sm:$0xff] %vm19_vm0, %v173_v0  ;;  %21 = vst.msk [vmem:[#allocation2 + $0x8] sm:$0xff] %vm19_vm0, %v173_v0  ;;  %v167_v2 = vld [vmem:[%s217_s1 + $0x8] sm:$0xff]   ;;  %vm137_vm3 = vcmask 519168  }
   0x2   :  { %157 = vmatpush3.bf16.msra.mxu0 %v166_v1  ;;  %v168_v3 = vld [vmem:[%s218_s0] sm:$0xff]  }
   0x3   :  { %158 = vmatprep.subr.bf16.mxu0 %v173_v0  ;;  %v148_v12 = vld [vmem:[%s219_s2] ss:$0 sm:$0xff] }
   0x6   :  { %159 = vmatpush3.bf16.msra.mxu0 %v167_v2 }
   0x8   :  { %v22_v4 = vld [vmem:[#allocation2] sm:$0xff]  ;;  %v23_v6 = vld [vmem:[#allocation2 + $0x8] sm:$0xff] }
   0x9   :  { %161 = vmatmul.mubr.msk.bf16.vlgmr.msra.gmra.mrb[0].mxu0 %vm47_vm2, %v168_v3 }
  0xdc   :  { %v85_v5 = vpop.f32.mrb[0].mxu0 }
  0xdd   :  { %v92_v7 = vadd.f32 %v85_v5, %v22_v4  ;;  %v162_v8 = vpop.f32.mrb[1].mxu0 }
  0xde   :  { %v88_v9 = vpop.f32.mrb[2].mxu0 }
  0xdf   :  { %95 = vst.msk [vmem:[#allocation2] sm:$0xff] %vm19_vm0, %v92_v7  ;;  %v93_v10 = vadd.f32 %v88_v9, %v23_v6  ;;  %v163_v11 = vpop.f32.mrb[3].mxu0 }
  0xe1   :  { %96 = vst.msk [vmem:[#allocation2 + $0x8] sm:$0xff] %vm19_vm0, %v93_v10 }
  0xe6   :  { %v100_v13 = vld [vmem:[#allocation2] sm:$0xff] }
  0xe7   :  { %v109_v14 = vadd.f32 %v148_v12, %v100_v13 }
  0xe8   :  { %v101_v15 = vld [vmem:[#allocation2 + $0x8] sm:$0xff] }
  0xe9   :  { %v111_v16 = vmul.f32 %v109_v14, %v109_v14  ;;  %v110_v17 = vadd.f32 %v148_v12, %v101_v15 }
  0xeb   :  { %v113_v18 = vmul.f32 %v111_v16, %v109_v14  ;;  %v112_v19 = vmul.f32 %v110_v17, %v110_v17 }
  0xed   :  { %v115_v20 = vmul.f32 0.044715, %v113_v18  ;;  %v114_v21 = vmul.f32 %v112_v19, %v110_v17 }
  0xef   :  { %v117_v22 = vadd.f32 %v115_v20, %v109_v14  ;;  %v116_v23 = vmul.f32 0.044715, %v114_v21 }
  0xf1   :  { %v119_v24 = vmul.f32 0.7978846, %v117_v22  ;;  %v118_v25 = vadd.f32 %v116_v23, %v110_v17 }
  0xf3   :  { %169 = vtanh.f32 %v119_v24  ;;  %v120_v26 = vmul.f32 0.7978846, %v118_v25 }
  0xf5   :  { %171 = vtanh.f32 %v120_v26 }
  0xfd   :  { %v170_v27 = vpop.eup %169 }
  0xfe   :  { %v123_v28 = vadd.f32 1.0, %v170_v27 }
  0xff   :  { %v172_v29 = vpop.eup %171 }
 0x100   :  { %v125_v30 = vmul.f32 0.5, %v123_v28  ;;  %v124_v31 = vadd.f32 1.0, %v172_v29 }
 0x102   :  { %v127_v32 = vmul.f32 %v125_v30, %v109_v14  ;;  %v126_v33 = vmul.f32 0.5, %v124_v31 }
 0x104   :  { %v151_v34 = vpack.c.bf16 %v127_v32, %v127_v32  ;;  %v128_v35 = vmul.f32 %v126_v33, %v110_v17 }
 0x106   :  { %138 = vst.msk [vmem:[%s220_s3] sm:$0xf] %vm137_vm3, %v151_v34  ;;  %v152_v36 = vpack.c.bf16 %v128_v35, %v128_v35 }
 0x108   :  { %139 = vst.msk [vmem:[%s220_s3 + $0x4] sm:$0xf] %vm137_vm3, %v152_v36 }

// kernel: _lambda_.21
= control target key start
LH: loop header
LB: loop body
LE: loop exit
PB: predicated region body
PF: predicated region fallthrough
CT: control target
= control target key end

     0   :  { %v274_v1 = vmov 0.0   ;;  %vm275_vm0 = vmmov 0   ;;  %vm29_vm1 = vcmask 261120   ;;  %s363_s0 = inlined_call_operand.vmem [shape: bf16[16,64], index: 0, kind: input, shape index: {}]   ;;  %s364_s1 = inlined_call_operand.vmem [shape: bf16[64,32], index: 1, kind: input, shape index: {}]   ;;  %s365_s2 = inlined_call_operand.vmem [shape: f32[1,32], index: 2, kind: input, shape index: {}, may-alias: {2,5}]   ;;  %s366_s3 = inlined_call_operand.vmem [shape: bf16[16,32], index: 3, kind: input, shape index: {}]   ;;  %s367_s4 = inlined_call_operand.vmem [shape: f32[1,32], index: 4, kind: input, shape index: {}]   ;;  %s368_s5 = inlined_call_operand.vmem [shape: f32[1,32], index: 5, kind: input, shape index: {}, may-alias: {2,5}]   ;;  %s369_s6 = inlined_call_operand.hbm [shape: f32[16,32], index: 6, kind: output, shape index: {}]  }
   0x1   :  { %v241_v0 = vld [vmem:[%s364_s1] sm:$0xff]   ;;  %224 = vmatprep.subr.bf16.mxu0 %v274_v1  ;;  %v242_v2 = vld [vmem:[%s364_s1 + $0x8] sm:$0xff]   ;;  %232 = vmatprep.mubr.msk.bf16.mxu0 %vm275_vm0, %v274_v1  ;;  %30 = vst.msk [vmem:[#allocation2] sm:$0xff] %vm29_vm1, %v274_v1  ;;  %31 = vst.msk [vmem:[#allocation2 + $0x8] sm:$0xff] %vm29_vm1, %v274_v1 }
   0x2   :  { %225 = vmatpush3.bf16.msra.mxu0 %v241_v0 }
   0x3   :  { %226 = vmatprep.subr.bf16.mxu0 %v274_v1 }
   0x4   :  { %11 = vsyncpa [#allocation4], 0  ;;  %v243_v3 = vld [vmem:[%s364_s1 + $0x10] sm:$0xff]   ;;  %v244_v4 = vld [vmem:[%s364_s1 + $0x18] sm:$0xff]   ;;  %vm73_vm2 = vcmask 523264   ;;  %s276_s11 = smov [#allocation3]  }
   0x5   :  { %v245_v5 = vld [vmem:[%s363_s0] sm:$0xff]   ;;  %s195_s12 = sshll.u32 %s276_s11, 4  ;;  %s196_s12 = int_to_ptr.vmem [resolvable:$true] %s195_s12 }
   0x6   :  { %227 = vmatpush3.bf16.msra.mxu0 %v242_v2  ;;  %v216_v14 = vld [vmem:[%s366_s3] sm:$0xff]   ;;  %s250_s13 = scalar_lea.vmem %s196_s12, 256  ;;  %p255_p1 = scmp.lt.s32.totalorder %s196_s12, %s196_s12 }
   0x7   :  { %228 = vmatprep.subr.bf16.mxu0 %v274_v1  ;;  %v212_v15 = vld [vmem:[%s365_s2] ss:$0 sm:$0xff]  ;;  %v217_v16 = vunpack.c.l.bf16 %v216_v14  ;;  %v218_v19 = vunpack.c.h.bf16 %v216_v14  ;;  %p251_p0 = scmp.ne.s32.totalorder %s196_s12, %s250_s13  ;;  %p256_p2 = scmp.lt.s32.totalorder %s250_s13, %s250_s13 }
   0x8   :  { %v32_v6 = vld [vmem:[#allocation2] sm:$0xff]  ;;  %v33_v8 = vld [vmem:[#allocation2 + $0x8] sm:$0xff] }
   0x9   :  { %v213_v43 = vld [vmem:[%s367_s4] ss:$0 sm:$0xff]  ;;  %p257_p3 = por %p256_p2, %p255_p1 }
   0xa   :  { %229 = vmatpush3.bf16.msra.mxu0 %v243_v3  ;;  %v214_v45 = vld [vmem:[%s368_s5] ss:$0 sm:$0xff] }
   0xb   :  { %230 = vmatprep.subr.bf16.mxu0 %v274_v1  ;;  %p258_p4 = pnand %p257_p3, %p251_p0 }
   0xe   :  { %231 = vmatpush3.bf16.msra.mxu0 %v244_v4 }
  0x11   :  { %233 = vmatmul.mubr.msk.bf16.vlgmr.msra.gmra.mrb[0].mxu0 %vm73_vm2, %v245_v5 }
  0xe4   :  { %v111_v7 = vpop.f32.mrb[0].mxu0 }
  0xe5   :  { %v118_v9 = vadd.f32 %v111_v7, %v32_v6  ;;  %v234_v10 = vpop.f32.mrb[1].mxu0 }
  0xe6   :  { %v114_v11 = vpop.f32.mrb[2].mxu0 }
  0xe7   :  { %121 = vst.msk [vmem:[#allocation2] sm:$0xff] %vm29_vm1, %v118_v9  ;;  %v119_v12 = vadd.f32 %v114_v11, %v33_v8  ;;  %v235_v13 = vpop.f32.mrb[3].mxu0 }
  0xe9   :  { %122 = vst.msk [vmem:[#allocation2 + $0x8] sm:$0xff] %vm29_vm1, %v119_v12 }
  0xee   :  { %v126_v17 = vld [vmem:[#allocation2] sm:$0xff] }
  0xef   :  { %v135_v18 = vadd.f32 %v212_v15, %v126_v17 }
  0xf0   :  { %v127_v20 = vld [vmem:[#allocation2 + $0x8] sm:$0xff] }
  0xf1   :  { %v141_v21 = vadd.f32 %v217_v16, %v135_v18  ;;  %v136_v22 = vadd.f32 %v212_v15, %v127_v20 }
  0xf3   :  { %v143_v23 = vsel %vm29_vm1, %v141_v21, 0.0  ;;  %v142_v24 = vadd.f32 %v218_v19, %v136_v22 }
  0xf4   :  { %144 = vadd.xlane.f32.xlu0 %v143_v23 }
  0xf5   :  { %v146_v25 = vsel %vm29_vm1, %v142_v24, 0.0 }
  0xf8   :  { %147 = vadd.xlane.f32.xlu0 %v146_v25 }
 0x181   :  { %v145_v26 = vpop.xlane.xlu0 %144 }
 0x182   :  { %v150_v27 = vmul.f32 0.03125, %v145_v26 }
 0x184   :  { %v152_v28 = vsub.f32 %v141_v21, %v150_v27 }
 0x185   :  { %v148_v29 = vpop.xlane.xlu0 %147 }
 0x186   :  { %v151_v30 = vmul.f32 0.03125, %v148_v29  ;;  %v154_v31 = vmul.f32 %v152_v28, %v152_v28 }
 0x188   :  { %v153_v32 = vsub.f32 %v142_v24, %v151_v30  ;;  %v156_v33 = vsel %vm29_vm1, %v154_v31, 0.0 }
 0x189   :  { %157 = vadd.xlane.f32.xlu1 %v156_v33 }
 0x18a   :  { %v155_v34 = vmul.f32 %v153_v32, %v153_v32 }
 0x18c   :  { %v159_v35 = vsel %vm29_vm1, %v155_v34, 0.0 }
 0x18d   :  { %160 = vadd.xlane.f32.xlu1 %v159_v35 }
 0x216   :  { %v158_v36 = vpop.xlane.xlu1 %157 }
 0x217   :  { %v162_v37 = vmul.f32 0.03125, %v158_v36 }
 0x219   :  { %v164_v38 = vadd.f32 1e-12, %v162_v37 }
 0x21a   :  { %v161_v39 = vpop.xlane.xlu1 %160 }
 0x21b   :  { %246 = vrsqrt.f32 %v164_v38  ;;  %v163_v40 = vmul.f32 0.03125, %v161_v39 }
 0x21d   :  { %v165_v41 = vadd.f32 1e-12, %v163_v40 }
 0x21f   :  { %248 = vrsqrt.f32 %v165_v41 }
 0x225   :  { %v247_v42 = vpop.eup %246 }
 0x226   :  { %v168_v44 = vmul.f32 %v247_v42, %v152_v28 }
 0x228   :  { %v177_v46 = vmul.f32 %v213_v43, %v168_v44 }
 0x229   :  { %v249_v47 = vpop.eup %248 }
 0x22a   :  { %v169_v48 = vmul.f32 %v249_v47, %v153_v32  ;;  %v186_v49 = vadd.f32 %v214_v45, %v177_v46 }
 0x22c   :  { %v178_v50 = vmul.f32 %v213_v43, %v169_v48  ;;  %188 = vst.msk [vmem:[#allocation3] sm:$0xff] %vm29_vm1, %v186_v49 }
 0x22e   :  { %v187_v51 = vadd.f32 %v214_v45, %v178_v50 }
 0x230   :  { %189 = vst.msk [vmem:[#allocation3 + $0x8] sm:$0xff] %vm29_vm1, %v187_v51 }
 0x231   :  { %261 = shalt.err (!%p258_p4)
}
 0x232   :  { %s262_s14 = scalar_lea.hbm %s369_s6, 256 }
 0x233   :  { %p263_p5 = scmp.ne.s32.totalorder %s369_s6, %s262_s14  ;;  %p266_p6 = scmp.lt.u32.totalorder %s262_s14, %s369_s6 }
 0x235   :  { %p268_p7 = pnand %p266_p6, %p263_p5 }
 0x237   :  { %271 = shalt.err (!%p268_p7)
}
 0x238   :  { %s277_s19 = smov 128   ;;  %s278_s20 = smov 8  }
 0x239   :  { %201 = dma.vmem_to_hbm [thread:$0]  %s196_s12, 256, %s369_s6, [#allocation4], %s277_s19, %s277_s19, %s278_s20  }
 0x23a   :  { %272 = dma.done.wait [#allocation4], 256  }
 0x23b   :  { %273 = vsyncadd [#allocation4], 4294967040 }
 0x23c   :  { %205 = vsyncpa [#allocation4], 1 }

// kernel: _lambda_.16
= control target key start
LH: loop header
LB: loop body
LE: loop exit
PB: predicated region body
PF: predicated region fallthrough
CT: control target
= control target key end

     0   :  { %vm28_vm0 = vcmask 261120   ;;  %v247_v0 = vmov 0.0   ;;  %vm248_vm1 = vmmov 0   ;;  %vm72_vm2 = vcmask 523264   ;;  %s325_s1 = inlined_call_operand.vmem [shape: bf16[64,32], index: 1, kind: input, shape index: {}]   ;;  %s326_s0 = inlined_call_operand.vmem [shape: bf16[16,64], index: 0, kind: input, shape index: {}]   ;;  %s327_s3 = inlined_call_operand.vmem [shape: bf16[16,32], index: 3, kind: input, shape index: {}]   ;;  %s328_s2 = inlined_call_operand.vmem [shape: f32[1,32], index: 2, kind: input, shape index: {}, may-alias: {2,5}]   ;;  %s329_s4 = inlined_call_operand.vmem [shape: f32[1,32], index: 4, kind: input, shape index: {}]   ;;  %s330_s5 = inlined_call_operand.vmem [shape: f32[1,32], index: 5, kind: input, shape index: {}, may-alias: {2,5}]   ;;  %s331_s6 = inlined_call_operand.vmem [shape: bf16[16,32], index: 6, kind: output, shape index: {}]  }
   0x1   :  { %224 = vmatprep.subr.bf16.mxu0 %v247_v0  ;;  %v238_v1 = vld [vmem:[%s325_s1] sm:$0xff]   ;;  %232 = vmatprep.mubr.msk.bf16.mxu0 %vm248_vm1, %v247_v0  ;;  %29 = vst.msk [vmem:[#allocation2] sm:$0xff] %vm28_vm0, %v247_v0  ;;  %30 = vst.msk [vmem:[#allocation2 + $0x8] sm:$0xff] %vm28_vm0, %v247_v0  ;;  %v239_v2 = vld [vmem:[%s325_s1 + $0x8] sm:$0xff]   ;;  %vm195_vm3 = vcmask 257024  }
   0x2   :  { %225 = vmatpush3.bf16.msra.mxu0 %v238_v1  ;;  %v240_v3 = vld [vmem:[%s325_s1 + $0x10] sm:$0xff]   ;;  %v241_v4 = vld [vmem:[%s325_s1 + $0x18] sm:$0xff]   ;;  %v242_v5 = vld [vmem:[%s326_s0] sm:$0xff]  }
   0x3   :  { %226 = vmatprep.subr.bf16.mxu0 %v247_v0  ;;  %v216_v14 = vld [vmem:[%s327_s3] sm:$0xff]  }
   0x4   :  { %v208_v15 = vld [vmem:[%s328_s2] ss:$0 sm:$0xff]  ;;  %v217_v16 = vunpack.c.l.bf16 %v216_v14  ;;  %v218_v19 = vunpack.c.h.bf16 %v216_v14 }
   0x5   :  { %v209_v43 = vld [vmem:[%s329_s4] ss:$0 sm:$0xff] }
   0x6   :  { %227 = vmatpush3.bf16.msra.mxu0 %v239_v2  ;;  %v210_v45 = vld [vmem:[%s330_s5] ss:$0 sm:$0xff] }
   0x7   :  { %228 = vmatprep.subr.bf16.mxu0 %v247_v0 }
   0x8   :  { %v31_v6 = vld [vmem:[#allocation2] sm:$0xff]  ;;  %v32_v8 = vld [vmem:[#allocation2 + $0x8] sm:$0xff] }
   0xa   :  { %229 = vmatpush3.bf16.msra.mxu0 %v240_v3 }
   0xb   :  { %230 = vmatprep.subr.bf16.mxu0 %v247_v0 }
   0xe   :  { %231 = vmatpush3.bf16.msra.mxu0 %v241_v4 }
  0x11   :  { %233 = vmatmul.mubr.msk.bf16.vlgmr.msra.gmra.mrb[0].mxu0 %vm72_vm2, %v242_v5 }
  0xe4   :  { %v110_v7 = vpop.f32.mrb[0].mxu0 }
  0xe5   :  { %v117_v9 = vadd.f32 %v110_v7, %v31_v6  ;;  %v234_v10 = vpop.f32.mrb[1].mxu0 }
  0xe6   :  { %v113_v11 = vpop.f32.mrb[2].mxu0 }
  0xe7   :  { %120 = vst.msk [vmem:[#allocation2] sm:$0xff] %vm28_vm0, %v117_v9  ;;  %v118_v12 = vadd.f32 %v113_v11, %v32_v8  ;;  %v235_v13 = vpop.f32.mrb[3].mxu0 }
  0xe9   :  { %121 = vst.msk [vmem:[#allocation2 + $0x8] sm:$0xff] %vm28_vm0, %v118_v12 }
  0xee   :  { %v125_v17 = vld [vmem:[#allocation2] sm:$0xff] }
  0xef   :  { %v134_v18 = vadd.f32 %v208_v15, %v125_v17 }
  0xf0   :  { %v126_v20 = vld [vmem:[#allocation2 + $0x8] sm:$0xff] }
  0xf1   :  { %v140_v21 = vadd.f32 %v217_v16, %v134_v18  ;;  %v135_v22 = vadd.f32 %v208_v15, %v126_v20 }
  0xf3   :  { %v142_v23 = vsel %vm28_vm0, %v140_v21, 0.0  ;;  %v141_v24 = vadd.f32 %v218_v19, %v135_v22 }
  0xf4   :  { %143 = vadd.xlane.f32.xlu0 %v142_v23 }
  0xf5   :  { %v145_v25 = vsel %vm28_vm0, %v141_v24, 0.0 }
  0xf8   :  { %146 = vadd.xlane.f32.xlu0 %v145_v25 }
 0x181   :  { %v144_v26 = vpop.xlane.xlu0 %143 }
 0x182   :  { %v149_v27 = vmul.f32 0.03125, %v144_v26 }
 0x184   :  { %v151_v28 = vsub.f32 %v140_v21, %v149_v27 }
 0x185   :  { %v147_v29 = vpop.xlane.xlu0 %146 }
 0x186   :  { %v150_v30 = vmul.f32 0.03125, %v147_v29  ;;  %v153_v31 = vmul.f32 %v151_v28, %v151_v28 }
 0x188   :  { %v152_v32 = vsub.f32 %v141_v24, %v150_v30  ;;  %v155_v33 = vsel %vm28_vm0, %v153_v31, 0.0 }
 0x189   :  { %156 = vadd.xlane.f32.xlu1 %v155_v33 }
 0x18a   :  { %v154_v34 = vmul.f32 %v152_v32, %v152_v32 }
 0x18c   :  { %v158_v35 = vsel %vm28_vm0, %v154_v34, 0.0 }
 0x18d   :  { %159 = vadd.xlane.f32.xlu1 %v158_v35 }
 0x216   :  { %v157_v36 = vpop.xlane.xlu1 %156 }
 0x217   :  { %v161_v37 = vmul.f32 0.03125, %v157_v36 }
 0x219   :  { %v163_v38 = vadd.f32 1e-12, %v161_v37 }
 0x21a   :  { %v160_v39 = vpop.xlane.xlu1 %159 }
 0x21b   :  { %243 = vrsqrt.f32 %v163_v38  ;;  %v162_v40 = vmul.f32 0.03125, %v160_v39 }
 0x21d   :  { %v164_v41 = vadd.f32 1e-12, %v162_v40 }
 0x21f   :  { %245 = vrsqrt.f32 %v164_v41 }
 0x225   :  { %v244_v42 = vpop.eup %243 }
 0x226   :  { %v167_v44 = vmul.f32 %v244_v42, %v151_v28 }
 0x228   :  { %v176_v46 = vmul.f32 %v209_v43, %v167_v44 }
 0x229   :  { %v246_v47 = vpop.eup %245 }
 0x22a   :  { %v185_v48 = vadd.f32 %v210_v45, %v176_v46  ;;  %v168_v49 = vmul.f32 %v246_v47, %v152_v32 }
 0x22c   :  { %v213_v50 = vpack.c.bf16 %v185_v48, %v185_v48  ;;  %v177_v51 = vmul.f32 %v209_v43, %v168_v49 }
 0x22e   :  { %196 = vst.msk [vmem:[%s331_s6] sm:$0xf] %vm195_vm3, %v213_v50  ;;  %v186_v52 = vadd.f32 %v210_v45, %v177_v51 }
 0x230   :  { %v214_v53 = vpack.c.bf16 %v186_v52, %v186_v52 }
 0x232   :  { %197 = vst.msk [vmem:[%s331_s6 + $0x4] sm:$0xf] %vm195_vm3, %v214_v53 }

</bundles_post_ra>
